<compile_context>
chip_gen: v7x
topology: tpu7x:2x2x1
jax: 0.10.0
libtpu: 0.0.40
codegen_flags: <defaults>
</compile_context>

<pallas_src>
import functools

import jax
import jax.numpy as jnp
import numpy as np
from jax import lax
from jax.experimental import pallas as pl
from jax.experimental.pallas import tpu as pltpu


def _spatial_attention_kernel(x_ref, w_ref, b_ref, o_ref, stage_ref,
                              *, K, p, H, W, C, bn, c_chunk):
    """One grid step: a (bn, C, H*W) lane-dense block of images.

    x_ref/o_ref : (bn, C, H*W) VMEM blocks (last dim lane-dense).
    w_ref       : SMEM (2*K*K,) conv weights, index = c*K*K + ky*K + kx.
    b_ref       : SMEM (1,)    conv bias.
    stage_ref   : VMEM (2, bn, HW + 2*Moff) zero-haloed flat (avg, max) maps,
                  images on sublanes, flat H*W positions on lanes.
    """
    HW = H * W
    Moff = p * W + p                   # flat halo length on each side of a map
    L = HW + 2 * Moff
    f32 = jnp.float32

    # ---- 1) zero only the flat halo borders (tiny; done every step because
    #         each TensorCore owns its own scratch under a "parallel" grid
    #         axis).  The HW interior is fully overwritten below.
    stage_ref[:, :, 0:Moff] = jnp.zeros((2, bn, Moff), f32)
    stage_ref[:, :, Moff + HW:L] = jnp.zeros((2, bn, Moff), f32)

    # ---- 2) channel-wise mean / max, streamed over C in chunks, all bn images
    #         at once on the lane-dense layout.
    def reduce_chunk(c0, cc, s, m):
        blk = x_ref[:, pl.ds(c0, cc), :].astype(f32)        # (bn, cc, HW)
        for j in range(cc):                                  # short static unroll
            ch = blk[:, j, :]
            s = s + ch
            m = jnp.maximum(m, ch)
        return s, m

    s = jnp.zeros((bn, HW), f32)
    m = jnp.full((bn, HW), -jnp.inf, f32)
    nck, rem = divmod(C, c_chunk)
    if nck <= 4:                                             # short: full unroll
        for i in range(nck):
            s, m = reduce_chunk(i * c_chunk, c_chunk, s, m)
    else:                                                    # long: real loop
        def rbody(i, carry):
            return reduce_chunk(i * c_chunk, c_chunk, *carry)
        s, m = lax.fori_loop(0, nck, rbody, (s, m))
    if rem:
        s, m = reduce_chunk(nck * c_chunk, rem, s, m)

    stage_ref[0, :, Moff:Moff + HW] = s * f32(1.0 / C)       # avg map (bn, HW)
    stage_ref[1, :, Moff:Moff + HW] = m                      # max map (bn, HW)

    # ---- 3) 7x7 conv (2 -> 1 channel), batched over all bn images.  In the
    #         flat layout a (ky, kx) tap is a pure lane shift of the haloed
    #         map; row wrap-around is masked per kx; out-of-range rows read the
    #         zero halo.  98 MACs total per grid step for all images.
    lane = lax.broadcasted_iota(jnp.int32, (1, HW), 1)
    if W & (W - 1) == 0:                                     # column index = lane % W
        col = lane & (W - 1)
    else:
        lf = lane.astype(f32)
        col = (lf - f32(W) * jnp.floor(lf * f32(1.0 / W))).astype(jnp.int32)

    acc = jnp.zeros((bn, HW), f32)
    for kx in range(K):
        dx = kx - p
        a0 = jnp.zeros((bn, HW), f32)                        # 2 accumulators break
        a1 = jnp.zeros((bn, HW), f32)                        # the serial MAC chain
        t = 0
        for c in range(2):
            for ky in range(K):
                wv = w_ref[c * K * K + ky * K + kx]          # SMEM scalar, read once
                d = Moff + (ky - p) * W + dx                 # static lane offset
                slab = stage_ref[c, :, d:d + HW]             # (bn, HW)
                if t & 1:
                    a1 = a1 + wv * slab
                else:
                    a0 = a0 + wv * slab
                t += 1
        g = a0 + a1
        if dx < 0:                                           # first |dx| columns invalid
            g = jnp.where(col >= -dx, g, f32(0.0))
        elif dx > 0:                                         # last dx columns invalid
            g = jnp.where(col < W - dx, g, f32(0.0))
        acc = acc + g

    att = jax.nn.sigmoid(acc + b_ref[0])                     # (bn, HW) f32

    # ---- 4) out = x * att, streamed over C on the lane-dense layout.  bf16
    #         inputs multiply natively in bf16 (v6e/v7x); the att broadcast is
    #         hoisted out of the loop.
    mul_dtype = o_ref.dtype if o_ref.dtype == jnp.bfloat16 else f32
    att3 = att.astype(mul_dtype)[:, None, :]                 # (bn, 1, HW)
    att_full = jnp.broadcast_to(att3, (bn, c_chunk, HW))

    def mul_chunk(c0, cc, a):
        xb = x_ref[:, pl.ds(c0, cc), :].astype(mul_dtype)    # (bn, cc, HW)
        o_ref[:, pl.ds(c0, cc), :] = (xb * a).astype(o_ref.dtype)

    if nck <= 4:
        for i in range(nck):
            mul_chunk(i * c_chunk, c_chunk, att_full)
    else:
        def mbody(i, carry):
            mul_chunk(i * c_chunk, c_chunk, att_full)
            return carry
        lax.fori_loop(0, nck, mbody, 0)
    if rem:
        mul_chunk(nck * c_chunk, rem, jnp.broadcast_to(att3, (bn, rem, HW)))


def _tpu_params():
    """(vmem_capacity_bytes, tensorcores_per_chip) with safe fallbacks."""
    kind = ""
    try:
        kind = jax.devices()[0].device_kind.lower()
    except Exception:
        pass
    vmem_cap = None
    n_cores = None
    try:
        info = pltpu.get_tpu_info()
        vmem_cap = int(info.vmem_capacity_bytes)
        n_cores = getattr(info, "num_cores", None) or getattr(info, "core_count", None)
    except Exception:
        pass
    if not vmem_cap:
        vmem_cap = (64 << 20) if "v7" in kind else (128 << 20)
    if not n_cores:
        n_cores = 2 if ("v7" in kind or "v4" in kind) else 1
    n_cores = min(max(int(n_cores), 1), 2)
    return vmem_cap, n_cores


def _pick_block(n, per_image_bytes, stage_bytes_per_image):
    """Images per grid step + vmem limit, generation-aware.

    Input and output blocks are each double-buffered by the pipeline
    (4x block bytes).  Single-TC chips (v5e/v6e): take the largest block that
    fits the VMEM budget.  Two-TC chips (v7x): keep >= 2 grid steps per core
    when the batch allows, so each core still has an i+1 prefetch to overlap.
    """
    vmem_cap, n_cores = _tpu_params()
    budget = int(vmem_cap * 0.4)
    denom = max(1, 4 * per_image_bytes + stage_bytes_per_image)
    cap = max(1, budget // denom)
    if n_cores >= 2 and n >= 2:
        target_steps = min(n, 2 * n_cores)
        cap = min(cap, max(1, n // target_steps))
    cap = min(cap, n)
    bn = 1
    for d in range(cap, 0, -1):                 # largest divisor of n <= cap
        if n % d == 0:
            bn = d
            break
    needed = bn * (4 * per_image_bytes + stage_bytes_per_image)
    vmem_limit = int(min(vmem_cap * 3 // 4, max(32 << 20, needed + (8 << 20))))
    return bn, vmem_limit


def spatial_attention(x, w_flat, b, kernel_size=7):
    """x: (N, C, H, W); w_flat: (2*K*K,) Conv2d(2,1,K) weight (OIHW flattened); b: (1,)."""
    N, C, H, W = x.shape
    K = kernel_size
    p = K // 2
    HW = H * W
    Moff = p * W + p
    L = HW + 2 * Moff

    # Lane-dense layout for all bulk traffic.  The contiguous trailing-dims
    # reshape is a metadata-only change for contiguous NCHW inputs.
    x_flat = x.reshape(N, C, HW)

    per_image = C * HW * x.dtype.itemsize
    stage_per_image = 2 * L * 4                 # f32 staging rows per image
    bn, vmem_limit = _pick_block(N, per_image, stage_per_image)
    grid = (N // bn,)
    c_chunk = min(16 if HW <= 512 else 8, C)

    kern = functools.partial(_spatial_attention_kernel,
                             K=K, p=p, H=H, W=W, C=C, bn=bn, c_chunk=c_chunk)
    out_flat = pl.pallas_call(
        kern,
        out_shape=jax.ShapeDtypeStruct((N, C, HW), x.dtype),
        grid=grid,
        in_specs=[
            pl.BlockSpec((bn, C, HW), lambda i: (i, 0, 0)),
            pl.BlockSpec(memory_space=pltpu.SMEM),   # conv weights (98 scalars)
            pl.BlockSpec(memory_space=pltpu.SMEM),   # conv bias (scalar)
        ],
        out_specs=pl.BlockSpec((bn, C, HW), lambda i: (i, 0, 0)),
        scratch_shapes=[
            pltpu.VMEM((2, bn, L), jnp.float32),     # zero-haloed flat (avg, max)
        ],
        compiler_params=pltpu.CompilerParams(
            dimension_semantics=("parallel",),
            vmem_limit_bytes=vmem_limit,
        ),
    )(x_flat, w_flat, b)
    return out_flat.reshape(N, C, H, W)


def spatial_attention_reference(x, w_flat, b, kernel_size=7):
    K = kernel_size
    avg = jnp.mean(x, axis=1, keepdims=True)
    mx = jnp.max(x, axis=1, keepdims=True)
    cat = jnp.concatenate([avg, mx], axis=1)              # (N, 2, H, W)
    w = w_flat.reshape(1, 2, K, K)
    conv = jax.lax.conv_general_dilated(
        cat, w, window_strides=(1, 1),
        padding=[(K // 2, K // 2), (K // 2, K // 2)],
        dimension_numbers=("NCHW", "OIHW", "NCHW")) + b[0]
    return x * jax.nn.sigmoid(conv)


if __name__ == "__main__":
    K = 7
    N, C, H, W = 2, 4, 16, 16

    key = jax.random.PRNGKey(0)
    kx, kw, kb = jax.random.split(key, 3)

    x = jax.random.normal(kx, (N, C, H, W), dtype=jnp.float32)
    # deterministic synthetic conv parameters: Conv2d(2, 1, kernel_size=7)
    w_flat = 0.1 * jax.random.normal(kw, (2 * K * K,), dtype=jnp.float32)
    b = 0.05 * jax.random.normal(kb, (1,), dtype=jnp.float32)

    out = spatial_attention(x, w_flat, b, kernel_size=K)
    out = jax.block_until_ready(out)

    ref = jax.block_until_ready(
        spatial_attention_reference(x, w_flat, b, kernel_size=K))
    np.testing.assert_allclose(np.asarray(out), np.asarray(ref),
                               rtol=1e-5, atol=1e-5)
    print("KERNEL_OK")
</pallas_src>

<mosaic_0001>
module attributes {stable_mosaic.version = 11 : i64} {
  func.func @_spatial_attention_kernel(%arg0: i32, %arg1: memref<2x4x256xf32, #tpu.memory_space<vmem>>, %arg2: memref<98xf32, #tpu.memory_space<smem>>, %arg3: memref<1xf32, #tpu.memory_space<smem>>, %arg4: memref<2x4x256xf32, #tpu.memory_space<vmem>>, %arg5: memref<2x2x358xf32, #tpu.memory_space<vmem>>) attributes {dimension_semantics = [#tpu.dimension_semantics<parallel>], iteration_bounds = array<i64: 1>, scalar_prefetch = 0 : i64, scratch_operands = 1 : i64, tpu.core_type = #tpu.core_type<tc>, window_params = [{transform_indices = @transform_0, window_bounds = array<i64: 2, 4, 256>}, {transform_indices = @transform_1, window_bounds = array<i64: 98>}, {transform_indices = @transform_2, window_bounds = array<i64: 1>}, {transform_indices = @transform_3, window_bounds = array<i64: 2, 4, 256>}]} {
    %cst = arith.constant 0.000000e+00 : f32
    %0 = vector.broadcast %cst : f32 to vector<2x2x51xf32>
    %c0 = arith.constant 0 : index
    %c0_0 = arith.constant 0 : index
    %c0_1 = arith.constant 0 : index
    %1 = vector.load %arg5[%c0, %c0_0, %c0_1] : memref<2x2x358xf32, #tpu.memory_space<vmem>>, vector<2x2x51xf32>
    tpu.vector_store %arg5[%c0, %c0_0, %c0_1], %0 {strides = array<i32>} : memref<2x2x358xf32, #tpu.memory_space<vmem>>, vector<2x2x51xf32>,
    %cst_2 = arith.constant 0.000000e+00 : f32
    %2 = vector.broadcast %cst_2 : f32 to vector<2x2x51xf32>
    %c0_3 = arith.constant 0 : index
    %c0_4 = arith.constant 0 : index
    %c307 = arith.constant 307 : index
    %3 = vector.load %arg5[%c0_3, %c0_4, %c307] : memref<2x2x358xf32, #tpu.memory_space<vmem>>, vector<2x2x51xf32>
    tpu.vector_store %arg5[%c0_3, %c0_4, %c307], %2 {strides = array<i32>} : memref<2x2x358xf32, #tpu.memory_space<vmem>>, vector<2x2x51xf32>,
    %cst_5 = arith.constant 0.000000e+00 : f32
    %4 = vector.broadcast %cst_5 : f32 to vector<2x256xf32>
    %cst_6 = arith.constant 0xFF800000 : f32
    %5 = vector.broadcast %cst_6 : f32 to vector<2x256xf32>
    %c0_7 = arith.constant 0 : index
    %c0_8 = arith.constant 0 : index
    %c0_9 = arith.constant 0 : index
    %6 = vector.load %arg1[%c0_7, %c0_8, %c0_9] : memref<2x4x256xf32, #tpu.memory_space<vmem>>, vector<2x4x256xf32>
    %7 = vector.extract_strided_slice %6 {offsets = [0, 0, 0], sizes = [2, 1, 256], strides = [1, 1, 1]} : vector<2x4x256xf32> to vector<2x1x256xf32>
    %8 = vector.shape_cast %7 : vector<2x1x256xf32> to vector<2x256xf32>
    %9 = arith.addf %4, %8 : vector<2x256xf32>
    %10 = arith.maximumf %5, %8 : vector<2x256xf32>
    %11 = vector.extract_strided_slice %6 {offsets = [0, 1, 0], sizes = [2, 1, 256], strides = [1, 1, 1]} : vector<2x4x256xf32> to vector<2x1x256xf32>
    %12 = vector.shape_cast %11 : vector<2x1x256xf32> to vector<2x256xf32>
    %13 = arith.addf %9, %12 : vector<2x256xf32>
    %14 = arith.maximumf %10, %12 : vector<2x256xf32>
    %15 = vector.extract_strided_slice %6 {offsets = [0, 2, 0], sizes = [2, 1, 256], strides = [1, 1, 1]} : vector<2x4x256xf32> to vector<2x1x256xf32>
    %16 = vector.shape_cast %15 : vector<2x1x256xf32> to vector<2x256xf32>
    %17 = arith.addf %13, %16 : vector<2x256xf32>
    %18 = arith.maximumf %14, %16 : vector<2x256xf32>
    %19 = vector.extract_strided_slice %6 {offsets = [0, 3, 0], sizes = [2, 1, 256], strides = [1, 1, 1]} : vector<2x4x256xf32> to vector<2x1x256xf32>
    %20 = vector.shape_cast %19 : vector<2x1x256xf32> to vector<2x256xf32>
    %21 = arith.addf %17, %20 : vector<2x256xf32>
    %22 = arith.maximumf %18, %20 : vector<2x256xf32>
    %cst_10 = arith.constant 2.500000e-01 : f32
    %23 = vector.broadcast %cst_10 : f32 to vector<2x256xf32>
    %24 = arith.mulf %21, %23 : vector<2x256xf32>
    %c0_11 = arith.constant 0 : index
    %c0_12 = arith.constant 0 : index
    %c51 = arith.constant 51 : index
    %25 = vector.load %arg5[%c0_11, %c0_12, %c51] : memref<2x2x358xf32, #tpu.memory_space<vmem>>, vector<1x2x256xf32>
    %26 = vector.shape_cast %25 : vector<1x2x256xf32> to vector<2x256xf32>
    %27 = vector.shape_cast %24 : vector<2x256xf32> to vector<1x2x256xf32>
    tpu.vector_store %arg5[%c0_11, %c0_12, %c51], %27 {strides = array<i32>} : memref<2x2x358xf32, #tpu.memory_space<vmem>>, vector<1x2x256xf32>,
    %c1 = arith.constant 1 : index
    %c0_13 = arith.constant 0 : index
    %c51_14 = arith.constant 51 : index
    %28 = vector.load %arg5[%c1, %c0_13, %c51_14] : memref<2x2x358xf32, #tpu.memory_space<vmem>>, vector<1x2x256xf32>
    %29 = vector.shape_cast %28 : vector<1x2x256xf32> to vector<2x256xf32>
    %30 = vector.shape_cast %22 : vector<2x256xf32> to vector<1x2x256xf32>
    tpu.vector_store %arg5[%c1, %c0_13, %c51_14], %30 {strides = array<i32>} : memref<2x2x358xf32, #tpu.memory_space<vmem>>, vector<1x2x256xf32>,
    %31 = tpu.iota {dimensions = array<i32: 1>} : vector<1x256xi32>
    %c15_i32 = arith.constant 15 : i32
    %32 = vector.broadcast %c15_i32 : i32 to vector<1x256xi32>
    %33 = arith.andi %31, %32 : vector<1x256xi32>
    %cst_15 = arith.constant 0.000000e+00 : f32
    %34 = vector.broadcast %cst_15 : f32 to vector<2x256xf32>
    %cst_16 = arith.constant 0.000000e+00 : f32
    %35 = vector.broadcast %cst_16 : f32 to vector<2x256xf32>
    %cst_17 = arith.constant 0.000000e+00 : f32
    %36 = vector.broadcast %cst_17 : f32 to vector<2x256xf32>
    %c0_18 = arith.constant 0 : index
    %37 = memref.load %arg2[%c0_18] : memref<98xf32, #tpu.memory_space<smem>>
    %c0_19 = arith.constant 0 : index
    %c0_20 = arith.constant 0 : index
    %c0_21 = arith.constant 0 : index
    %38 = vector.load %arg5[%c0_19, %c0_20, %c0_21] : memref<2x2x358xf32, #tpu.memory_space<vmem>>, vector<1x2x256xf32>
    %39 = vector.shape_cast %38 : vector<1x2x256xf32> to vector<2x256xf32>
    %40 = vector.broadcast %37 : f32 to vector<2x256xf32>
    %41 = arith.mulf %40, %39 : vector<2x256xf32>
    %42 = arith.addf %35, %41 : vector<2x256xf32>
    %c7 = arith.constant 7 : index
    %43 = memref.load %arg2[%c7] : memref<98xf32, #tpu.memory_space<smem>>
    %c0_22 = arith.constant 0 : index
    %c0_23 = arith.constant 0 : index
    %c16 = arith.constant 16 : index
    %44 = vector.load %arg5[%c0_22, %c0_23, %c16] : memref<2x2x358xf32, #tpu.memory_space<vmem>>, vector<1x2x256xf32>
    %45 = vector.shape_cast %44 : vector<1x2x256xf32> to vector<2x256xf32>
    %46 = vector.broadcast %43 : f32 to vector<2x256xf32>
    %47 = arith.mulf %46, %45 : vector<2x256xf32>
    %48 = arith.addf %36, %47 : vector<2x256xf32>
    %c14 = arith.constant 14 : index
    %49 = memref.load %arg2[%c14] : memref<98xf32, #tpu.memory_space<smem>>
    %c0_24 = arith.constant 0 : index
    %c0_25 = arith.constant 0 : index
    %c32 = arith.constant 32 : index
    %50 = vector.load %arg5[%c0_24, %c0_25, %c32] : memref<2x2x358xf32, #tpu.memory_space<vmem>>, vector<1x2x256xf32>
    %51 = vector.shape_cast %50 : vector<1x2x256xf32> to vector<2x256xf32>
    %52 = vector.broadcast %49 : f32 to vector<2x256xf32>
    %53 = arith.mulf %52, %51 : vector<2x256xf32>
    %54 = arith.addf %42, %53 : vector<2x256xf32>
    %c21 = arith.constant 21 : index
    %55 = memref.load %arg2[%c21] : memref<98xf32, #tpu.memory_space<smem>>
    %c0_26 = arith.constant 0 : index
    %c0_27 = arith.constant 0 : index
    %c48 = arith.constant 48 : index
    %56 = vector.load %arg5[%c0_26, %c0_27, %c48] : memref<2x2x358xf32, #tpu.memory_space<vmem>>, vector<1x2x256xf32>
    %57 = vector.shape_cast %56 : vector<1x2x256xf32> to vector<2x256xf32>
    %58 = vector.broadcast %55 : f32 to vector<2x256xf32>
    %59 = arith.mulf %58, %57 : vector<2x256xf32>
    %60 = arith.addf %48, %59 : vector<2x256xf32>
    %c28 = arith.constant 28 : index
    %61 = memref.load %arg2[%c28] : memref<98xf32, #tpu.memory_space<smem>>
    %c0_28 = arith.constant 0 : index
    %c0_29 = arith.constant 0 : index
    %c64 = arith.constant 64 : index
    %62 = vector.load %arg5[%c0_28, %c0_29, %c64] : memref<2x2x358xf32, #tpu.memory_space<vmem>>, vector<1x2x256xf32>
    %63 = vector.shape_cast %62 : vector<1x2x256xf32> to vector<2x256xf32>
    %64 = vector.broadcast %61 : f32 to vector<2x256xf32>
    %65 = arith.mulf %64, %63 : vector<2x256xf32>
    %66 = arith.addf %54, %65 : vector<2x256xf32>
    %c35 = arith.constant 35 : index
    %67 = memref.load %arg2[%c35] : memref<98xf32, #tpu.memory_space<smem>>
    %c0_30 = arith.constant 0 : index
    %c0_31 = arith.constant 0 : index
    %c80 = arith.constant 80 : index
    %68 = vector.load %arg5[%c0_30, %c0_31, %c80] : memref<2x2x358xf32, #tpu.memory_space<vmem>>, vector<1x2x256xf32>
    %69 = vector.shape_cast %68 : vector<1x2x256xf32> to vector<2x256xf32>
    %70 = vector.broadcast %67 : f32 to vector<2x256xf32>
    %71 = arith.mulf %70, %69 : vector<2x256xf32>
    %72 = arith.addf %60, %71 : vector<2x256xf32>
    %c42 = arith.constant 42 : index
    %73 = memref.load %arg2[%c42] : memref<98xf32, #tpu.memory_space<smem>>
    %c0_32 = arith.constant 0 : index
    %c0_33 = arith.constant 0 : index
    %c96 = arith.constant 96 : index
    %74 = vector.load %arg5[%c0_32, %c0_33, %c96] : memref<2x2x358xf32, #tpu.memory_space<vmem>>, vector<1x2x256xf32>
    %75 = vector.shape_cast %74 : vector<1x2x256xf32> to vector<2x256xf32>
    %76 = vector.broadcast %73 : f32 to vector<2x256xf32>
    %77 = arith.mulf %76, %75 : vector<2x256xf32>
    %78 = arith.addf %66, %77 : vector<2x256xf32>
    %c49 = arith.constant 49 : index
    %79 = memref.load %arg2[%c49] : memref<98xf32, #tpu.memory_space<smem>>
    %c1_34 = arith.constant 1 : index
    %c0_35 = arith.constant 0 : index
    %c0_36 = arith.constant 0 : index
    %80 = vector.load %arg5[%c1_34, %c0_35, %c0_36] : memref<2x2x358xf32, #tpu.memory_space<vmem>>, vector<1x2x256xf32>
    %81 = vector.shape_cast %80 : vector<1x2x256xf32> to vector<2x256xf32>
    %82 = vector.broadcast %79 : f32 to vector<2x256xf32>
    %83 = arith.mulf %82, %81 : vector<2x256xf32>
    %84 = arith.addf %72, %83 : vector<2x256xf32>
    %c56 = arith.constant 56 : index
    %85 = memref.load %arg2[%c56] : memref<98xf32, #tpu.memory_space<smem>>
    %c1_37 = arith.constant 1 : index
    %c0_38 = arith.constant 0 : index
    %c16_39 = arith.constant 16 : index
    %86 = vector.load %arg5[%c1_37, %c0_38, %c16_39] : memref<2x2x358xf32, #tpu.memory_space<vmem>>, vector<1x2x256xf32>
    %87 = vector.shape_cast %86 : vector<1x2x256xf32> to vector<2x256xf32>
    %88 = vector.broadcast %85 : f32 to vector<2x256xf32>
    %89 = arith.mulf %88, %87 : vector<2x256xf32>
    %90 = arith.addf %78, %89 : vector<2x256xf32>
    %c63 = arith.constant 63 : index
    %91 = memref.load %arg2[%c63] : memref<98xf32, #tpu.memory_space<smem>>
    %c1_40 = arith.constant 1 : index
    %c0_41 = arith.constant 0 : index
    %c32_42 = arith.constant 32 : index
    %92 = vector.load %arg5[%c1_40, %c0_41, %c32_42] : memref<2x2x358xf32, #tpu.memory_space<vmem>>, vector<1x2x256xf32>
    %93 = vector.shape_cast %92 : vector<1x2x256xf32> to vector<2x256xf32>
    %94 = vector.broadcast %91 : f32 to vector<2x256xf32>
    %95 = arith.mulf %94, %93 : vector<2x256xf32>
    %96 = arith.addf %84, %95 : vector<2x256xf32>
    %c70 = arith.constant 70 : index
    %97 = memref.load %arg2[%c70] : memref<98xf32, #tpu.memory_space<smem>>
    %c1_43 = arith.constant 1 : index
    %c0_44 = arith.constant 0 : index
    %c48_45 = arith.constant 48 : index
    %98 = vector.load %arg5[%c1_43, %c0_44, %c48_45] : memref<2x2x358xf32, #tpu.memory_space<vmem>>, vector<1x2x256xf32>
    %99 = vector.shape_cast %98 : vector<1x2x256xf32> to vector<2x256xf32>
    %100 = vector.broadcast %97 : f32 to vector<2x256xf32>
    %101 = arith.mulf %100, %99 : vector<2x256xf32>
    %102 = arith.addf %90, %101 : vector<2x256xf32>
    %c77 = arith.constant 77 : index
    %103 = memref.load %arg2[%c77] : memref<98xf32, #tpu.memory_space<smem>>
    %c1_46 = arith.constant 1 : index
    %c0_47 = arith.constant 0 : index
    %c64_48 = arith.constant 64 : index
    %104 = vector.load %arg5[%c1_46, %c0_47, %c64_48] : memref<2x2x358xf32, #tpu.memory_space<vmem>>, vector<1x2x256xf32>
    %105 = vector.shape_cast %104 : vector<1x2x256xf32> to vector<2x256xf32>
    %106 = vector.broadcast %103 : f32 to vector<2x256xf32>
    %107 = arith.mulf %106, %105 : vector<2x256xf32>
    %108 = arith.addf %96, %107 : vector<2x256xf32>
    %c84 = arith.constant 84 : index
    %109 = memref.load %arg2[%c84] : memref<98xf32, #tpu.memory_space<smem>>
    %c1_49 = arith.constant 1 : index
    %c0_50 = arith.constant 0 : index
    %c80_51 = arith.constant 80 : index
    %110 = vector.load %arg5[%c1_49, %c0_50, %c80_51] : memref<2x2x358xf32, #tpu.memory_space<vmem>>, vector<1x2x256xf32>
    %111 = vector.shape_cast %110 : vector<1x2x256xf32> to vector<2x256xf32>
    %112 = vector.broadcast %109 : f32 to vector<2x256xf32>
    %113 = arith.mulf %112, %111 : vector<2x256xf32>
    %114 = arith.addf %102, %113 : vector<2x256xf32>
    %c91 = arith.constant 91 : index
    %115 = memref.load %arg2[%c91] : memref<98xf32, #tpu.memory_space<smem>>
    %c1_52 = arith.constant 1 : index
    %c0_53 = arith.constant 0 : index
    %c96_54 = arith.constant 96 : index
    %116 = vector.load %arg5[%c1_52, %c0_53, %c96_54] : memref<2x2x358xf32, #tpu.memory_space<vmem>>, vector<1x2x256xf32>
    %117 = vector.shape_cast %116 : vector<1x2x256xf32> to vector<2x256xf32>
    %118 = vector.broadcast %115 : f32 to vector<2x256xf32>
    %119 = arith.mulf %118, %117 : vector<2x256xf32>
    %120 = arith.addf %108, %119 : vector<2x256xf32>
    %121 = arith.addf %114, %120 : vector<2x256xf32>
    %c3_i32 = arith.constant 3 : i32
    %122 = vector.broadcast %c3_i32 : i32 to vector<1x256xi32>
    %123 = arith.cmpi sge, %33, %122 : vector<1x256xi32>
    %cst_55 = arith.constant 0.000000e+00 : f32
    %124 = vector.shape_cast %123 : vector<1x256xi1> to vector<1x256xi1>
    %125 = vector.broadcast %124 : vector<1x256xi1> to vector<2x256xi1>
    %126 = vector.broadcast %cst_55 : f32 to vector<2x256xf32>
    %127 = arith.select %125, %121, %126 : vector<2x256xi1>, vector<2x256xf32>
    %128 = arith.addf %34, %127 : vector<2x256xf32>
    %cst_56 = arith.constant 0.000000e+00 : f32
    %129 = vector.broadcast %cst_56 : f32 to vector<2x256xf32>
    %cst_57 = arith.constant 0.000000e+00 : f32
    %130 = vector.broadcast %cst_57 : f32 to vector<2x256xf32>
    %c1_58 = arith.constant 1 : index
    %131 = memref.load %arg2[%c1_58] : memref<98xf32, #tpu.memory_space<smem>>
    %c0_59 = arith.constant 0 : index
    %c0_60 = arith.constant 0 : index
    %c1_61 = arith.constant 1 : index
    %132 = vector.load %arg5[%c0_59, %c0_60, %c1_61] : memref<2x2x358xf32, #tpu.memory_space<vmem>>, vector<1x2x256xf32>
    %133 = vector.shape_cast %132 : vector<1x2x256xf32> to vector<2x256xf32>
    %134 = vector.broadcast %131 : f32 to vector<2x256xf32>
    %135 = arith.mulf %134, %133 : vector<2x256xf32>
    %136 = arith.addf %129, %135 : vector<2x256xf32>
    %c8 = arith.constant 8 : index
    %137 = memref.load %arg2[%c8] : memref<98xf32, #tpu.memory_space<smem>>
    %c0_62 = arith.constant 0 : index
    %c0_63 = arith.constant 0 : index
    %c17 = arith.constant 17 : index
    %138 = vector.load %arg5[%c0_62, %c0_63, %c17] : memref<2x2x358xf32, #tpu.memory_space<vmem>>, vector<1x2x256xf32>
    %139 = vector.shape_cast %138 : vector<1x2x256xf32> to vector<2x256xf32>
    %140 = vector.broadcast %137 : f32 to vector<2x256xf32>
    %141 = arith.mulf %140, %139 : vector<2x256xf32>
    %142 = arith.addf %130, %141 : vector<2x256xf32>
    %c15 = arith.constant 15 : index
    %143 = memref.load %arg2[%c15] : memref<98xf32, #tpu.memory_space<smem>>
    %c0_64 = arith.constant 0 : index
    %c0_65 = arith.constant 0 : index
    %c33 = arith.constant 33 : index
    %144 = vector.load %arg5[%c0_64, %c0_65, %c33] : memref<2x2x358xf32, #tpu.memory_space<vmem>>, vector<1x2x256xf32>
    %145 = vector.shape_cast %144 : vector<1x2x256xf32> to vector<2x256xf32>
    %146 = vector.broadcast %143 : f32 to vector<2x256xf32>
    %147 = arith.mulf %146, %145 : vector<2x256xf32>
    %148 = arith.addf %136, %147 : vector<2x256xf32>
    %c22 = arith.constant 22 : index
    %149 = memref.load %arg2[%c22] : memref<98xf32, #tpu.memory_space<smem>>
    %c0_66 = arith.constant 0 : index
    %c0_67 = arith.constant 0 : index
    %c49_68 = arith.constant 49 : index
    %150 = vector.load %arg5[%c0_66, %c0_67, %c49_68] : memref<2x2x358xf32, #tpu.memory_space<vmem>>, vector<1x2x256xf32>
    %151 = vector.shape_cast %150 : vector<1x2x256xf32> to vector<2x256xf32>
    %152 = vector.broadcast %149 : f32 to vector<2x256xf32>
    %153 = arith.mulf %152, %151 : vector<2x256xf32>
    %154 = arith.addf %142, %153 : vector<2x256xf32>
    %c29 = arith.constant 29 : index
    %155 = memref.load %arg2[%c29] : memref<98xf32, #tpu.memory_space<smem>>
    %c0_69 = arith.constant 0 : index
    %c0_70 = arith.constant 0 : index
    %c65 = arith.constant 65 : index
    %156 = vector.load %arg5[%c0_69, %c0_70, %c65] : memref<2x2x358xf32, #tpu.memory_space<vmem>>, vector<1x2x256xf32>
    %157 = vector.shape_cast %156 : vector<1x2x256xf32> to vector<2x256xf32>
    %158 = vector.broadcast %155 : f32 to vector<2x256xf32>
    %159 = arith.mulf %158, %157 : vector<2x256xf32>
    %160 = arith.addf %148, %159 : vector<2x256xf32>
    %c36 = arith.constant 36 : index
    %161 = memref.load %arg2[%c36] : memref<98xf32, #tpu.memory_space<smem>>
    %c0_71 = arith.constant 0 : index
    %c0_72 = arith.constant 0 : index
    %c81 = arith.constant 81 : index
    %162 = vector.load %arg5[%c0_71, %c0_72, %c81] : memref<2x2x358xf32, #tpu.memory_space<vmem>>, vector<1x2x256xf32>
    %163 = vector.shape_cast %162 : vector<1x2x256xf32> to vector<2x256xf32>
    %164 = vector.broadcast %161 : f32 to vector<2x256xf32>
    %165 = arith.mulf %164, %163 : vector<2x256xf32>
    %166 = arith.addf %154, %165 : vector<2x256xf32>
    %c43 = arith.constant 43 : index
    %167 = memref.load %arg2[%c43] : memref<98xf32, #tpu.memory_space<smem>>
    %c0_73 = arith.constant 0 : index
    %c0_74 = arith.constant 0 : index
    %c97 = arith.constant 97 : index
    %168 = vector.load %arg5[%c0_73, %c0_74, %c97] : memref<2x2x358xf32, #tpu.memory_space<vmem>>, vector<1x2x256xf32>
    %169 = vector.shape_cast %168 : vector<1x2x256xf32> to vector<2x256xf32>
    %170 = vector.broadcast %167 : f32 to vector<2x256xf32>
    %171 = arith.mulf %170, %169 : vector<2x256xf32>
    %172 = arith.addf %160, %171 : vector<2x256xf32>
    %c50 = arith.constant 50 : index
    %173 = memref.load %arg2[%c50] : memref<98xf32, #tpu.memory_space<smem>>
    %c1_75 = arith.constant 1 : index
    %c0_76 = arith.constant 0 : index
    %c1_77 = arith.constant 1 : index
    %174 = vector.load %arg5[%c1_75, %c0_76, %c1_77] : memref<2x2x358xf32, #tpu.memory_space<vmem>>, vector<1x2x256xf32>
    %175 = vector.shape_cast %174 : vector<1x2x256xf32> to vector<2x256xf32>
    %176 = vector.broadcast %173 : f32 to vector<2x256xf32>
    %177 = arith.mulf %176, %175 : vector<2x256xf32>
    %178 = arith.addf %166, %177 : vector<2x256xf32>
    %c57 = arith.constant 57 : index
    %179 = memref.load %arg2[%c57] : memref<98xf32, #tpu.memory_space<smem>>
    %c1_78 = arith.constant 1 : index
    %c0_79 = arith.constant 0 : index
    %c17_80 = arith.constant 17 : index
    %180 = vector.load %arg5[%c1_78, %c0_79, %c17_80] : memref<2x2x358xf32, #tpu.memory_space<vmem>>, vector<1x2x256xf32>
    %181 = vector.shape_cast %180 : vector<1x2x256xf32> to vector<2x256xf32>
    %182 = vector.broadcast %179 : f32 to vector<2x256xf32>
    %183 = arith.mulf %182, %181 : vector<2x256xf32>
    %184 = arith.addf %172, %183 : vector<2x256xf32>
    %c64_81 = arith.constant 64 : index
    %185 = memref.load %arg2[%c64_81] : memref<98xf32, #tpu.memory_space<smem>>
    %c1_82 = arith.constant 1 : index
    %c0_83 = arith.constant 0 : index
    %c33_84 = arith.constant 33 : index
    %186 = vector.load %arg5[%c1_82, %c0_83, %c33_84] : memref<2x2x358xf32, #tpu.memory_space<vmem>>, vector<1x2x256xf32>
    %187 = vector.shape_cast %186 : vector<1x2x256xf32> to vector<2x256xf32>
    %188 = vector.broadcast %185 : f32 to vector<2x256xf32>
    %189 = arith.mulf %188, %187 : vector<2x256xf32>
    %190 = arith.addf %178, %189 : vector<2x256xf32>
    %c71 = arith.constant 71 : index
    %191 = memref.load %arg2[%c71] : memref<98xf32, #tpu.memory_space<smem>>
    %c1_85 = arith.constant 1 : index
    %c0_86 = arith.constant 0 : index
    %c49_87 = arith.constant 49 : index
    %192 = vector.load %arg5[%c1_85, %c0_86, %c49_87] : memref<2x2x358xf32, #tpu.memory_space<vmem>>, vector<1x2x256xf32>
    %193 = vector.shape_cast %192 : vector<1x2x256xf32> to vector<2x256xf32>
    %194 = vector.broadcast %191 : f32 to vector<2x256xf32>
    %195 = arith.mulf %194, %193 : vector<2x256xf32>
    %196 = arith.addf %184, %195 : vector<2x256xf32>
    %c78 = arith.constant 78 : index
    %197 = memref.load %arg2[%c78] : memref<98xf32, #tpu.memory_space<smem>>
    %c1_88 = arith.constant 1 : index
    %c0_89 = arith.constant 0 : index
    %c65_90 = arith.constant 65 : index
    %198 = vector.load %arg5[%c1_88, %c0_89, %c65_90] : memref<2x2x358xf32, #tpu.memory_space<vmem>>, vector<1x2x256xf32>
    %199 = vector.shape_cast %198 : vector<1x2x256xf32> to vector<2x256xf32>
    %200 = vector.broadcast %197 : f32 to vector<2x256xf32>
    %201 = arith.mulf %200, %199 : vector<2x256xf32>
    %202 = arith.addf %190, %201 : vector<2x256xf32>
    %c85 = arith.constant 85 : index
    %203 = memref.load %arg2[%c85] : memref<98xf32, #tpu.memory_space<smem>>
    %c1_91 = arith.constant 1 : index
    %c0_92 = arith.constant 0 : index
    %c81_93 = arith.constant 81 : index
    %204 = vector.load %arg5[%c1_91, %c0_92, %c81_93] : memref<2x2x358xf32, #tpu.memory_space<vmem>>, vector<1x2x256xf32>
    %205 = vector.shape_cast %204 : vector<1x2x256xf32> to vector<2x256xf32>
    %206 = vector.broadcast %203 : f32 to vector<2x256xf32>
    %207 = arith.mulf %206, %205 : vector<2x256xf32>
    %208 = arith.addf %196, %207 : vector<2x256xf32>
    %c92 = arith.constant 92 : index
    %209 = memref.load %arg2[%c92] : memref<98xf32, #tpu.memory_space<smem>>
    %c1_94 = arith.constant 1 : index
    %c0_95 = arith.constant 0 : index
    %c97_96 = arith.constant 97 : index
    %210 = vector.load %arg5[%c1_94, %c0_95, %c97_96] : memref<2x2x358xf32, #tpu.memory_space<vmem>>, vector<1x2x256xf32>
    %211 = vector.shape_cast %210 : vector<1x2x256xf32> to vector<2x256xf32>
    %212 = vector.broadcast %209 : f32 to vector<2x256xf32>
    %213 = arith.mulf %212, %211 : vector<2x256xf32>
    %214 = arith.addf %202, %213 : vector<2x256xf32>
    %215 = arith.addf %208, %214 : vector<2x256xf32>
    %c2_i32 = arith.constant 2 : i32
    %216 = vector.broadcast %c2_i32 : i32 to vector<1x256xi32>
    %217 = arith.cmpi sge, %33, %216 : vector<1x256xi32>
    %cst_97 = arith.constant 0.000000e+00 : f32
    %218 = vector.shape_cast %217 : vector<1x256xi1> to vector<1x256xi1>
    %219 = vector.broadcast %218 : vector<1x256xi1> to vector<2x256xi1>
    %220 = vector.broadcast %cst_97 : f32 to vector<2x256xf32>
    %221 = arith.select %219, %215, %220 : vector<2x256xi1>, vector<2x256xf32>
    %222 = arith.addf %128, %221 : vector<2x256xf32>
    %cst_98 = arith.constant 0.000000e+00 : f32
    %223 = vector.broadcast %cst_98 : f32 to vector<2x256xf32>
    %cst_99 = arith.constant 0.000000e+00 : f32
    %224 = vector.broadcast %cst_99 : f32 to vector<2x256xf32>
    %c2 = arith.constant 2 : index
    %225 = memref.load %arg2[%c2] : memref<98xf32, #tpu.memory_space<smem>>
    %c0_100 = arith.constant 0 : index
    %c0_101 = arith.constant 0 : index
    %c2_102 = arith.constant 2 : index
    %226 = vector.load %arg5[%c0_100, %c0_101, %c2_102] : memref<2x2x358xf32, #tpu.memory_space<vmem>>, vector<1x2x256xf32>
    %227 = vector.shape_cast %226 : vector<1x2x256xf32> to vector<2x256xf32>
    %228 = vector.broadcast %225 : f32 to vector<2x256xf32>
    %229 = arith.mulf %228, %227 : vector<2x256xf32>
    %230 = arith.addf %223, %229 : vector<2x256xf32>
    %c9 = arith.constant 9 : index
    %231 = memref.load %arg2[%c9] : memref<98xf32, #tpu.memory_space<smem>>
    %c0_103 = arith.constant 0 : index
    %c0_104 = arith.constant 0 : index
    %c18 = arith.constant 18 : index
    %232 = vector.load %arg5[%c0_103, %c0_104, %c18] : memref<2x2x358xf32, #tpu.memory_space<vmem>>, vector<1x2x256xf32>
    %233 = vector.shape_cast %232 : vector<1x2x256xf32> to vector<2x256xf32>
    %234 = vector.broadcast %231 : f32 to vector<2x256xf32>
    %235 = arith.mulf %234, %233 : vector<2x256xf32>
    %236 = arith.addf %224, %235 : vector<2x256xf32>
    %c16_105 = arith.constant 16 : index
    %237 = memref.load %arg2[%c16_105] : memref<98xf32, #tpu.memory_space<smem>>
    %c0_106 = arith.constant 0 : index
    %c0_107 = arith.constant 0 : index
    %c34 = arith.constant 34 : index
    %238 = vector.load %arg5[%c0_106, %c0_107, %c34] : memref<2x2x358xf32, #tpu.memory_space<vmem>>, vector<1x2x256xf32>
    %239 = vector.shape_cast %238 : vector<1x2x256xf32> to vector<2x256xf32>
    %240 = vector.broadcast %237 : f32 to vector<2x256xf32>
    %241 = arith.mulf %240, %239 : vector<2x256xf32>
    %242 = arith.addf %230, %241 : vector<2x256xf32>
    %c23 = arith.constant 23 : index
    %243 = memref.load %arg2[%c23] : memref<98xf32, #tpu.memory_space<smem>>
    %c0_108 = arith.constant 0 : index
    %c0_109 = arith.constant 0 : index
    %c50_110 = arith.constant 50 : index
    %244 = vector.load %arg5[%c0_108, %c0_109, %c50_110] : memref<2x2x358xf32, #tpu.memory_space<vmem>>, vector<1x2x256xf32>
    %245 = vector.shape_cast %244 : vector<1x2x256xf32> to vector<2x256xf32>
    %246 = vector.broadcast %243 : f32 to vector<2x256xf32>
    %247 = arith.mulf %246, %245 : vector<2x256xf32>
    %248 = arith.addf %236, %247 : vector<2x256xf32>
    %c30 = arith.constant 30 : index
    %249 = memref.load %arg2[%c30] : memref<98xf32, #tpu.memory_space<smem>>
    %c0_111 = arith.constant 0 : index
    %c0_112 = arith.constant 0 : index
    %c66 = arith.constant 66 : index
    %250 = vector.load %arg5[%c0_111, %c0_112, %c66] : memref<2x2x358xf32, #tpu.memory_space<vmem>>, vector<1x2x256xf32>
    %251 = vector.shape_cast %250 : vector<1x2x256xf32> to vector<2x256xf32>
    %252 = vector.broadcast %249 : f32 to vector<2x256xf32>
    %253 = arith.mulf %252, %251 : vector<2x256xf32>
    %254 = arith.addf %242, %253 : vector<2x256xf32>
    %c37 = arith.constant 37 : index
    %255 = memref.load %arg2[%c37] : memref<98xf32, #tpu.memory_space<smem>>
    %c0_113 = arith.constant 0 : index
    %c0_114 = arith.constant 0 : index
    %c82 = arith.constant 82 : index
    %256 = vector.load %arg5[%c0_113, %c0_114, %c82] : memref<2x2x358xf32, #tpu.memory_space<vmem>>, vector<1x2x256xf32>
    %257 = vector.shape_cast %256 : vector<1x2x256xf32> to vector<2x256xf32>
    %258 = vector.broadcast %255 : f32 to vector<2x256xf32>
    %259 = arith.mulf %258, %257 : vector<2x256xf32>
    %260 = arith.addf %248, %259 : vector<2x256xf32>
    %c44 = arith.constant 44 : index
    %261 = memref.load %arg2[%c44] : memref<98xf32, #tpu.memory_space<smem>>
    %c0_115 = arith.constant 0 : index
    %c0_116 = arith.constant 0 : index
    %c98 = arith.constant 98 : index
    %262 = vector.load %arg5[%c0_115, %c0_116, %c98] : memref<2x2x358xf32, #tpu.memory_space<vmem>>, vector<1x2x256xf32>
    %263 = vector.shape_cast %262 : vector<1x2x256xf32> to vector<2x256xf32>
    %264 = vector.broadcast %261 : f32 to vector<2x256xf32>
    %265 = arith.mulf %264, %263 : vector<2x256xf32>
    %266 = arith.addf %254, %265 : vector<2x256xf32>
    %c51_117 = arith.constant 51 : index
    %267 = memref.load %arg2[%c51_117] : memref<98xf32, #tpu.memory_space<smem>>
    %c1_118 = arith.constant 1 : index
    %c0_119 = arith.constant 0 : index
    %c2_120 = arith.constant 2 : index
    %268 = vector.load %arg5[%c1_118, %c0_119, %c2_120] : memref<2x2x358xf32, #tpu.memory_space<vmem>>, vector<1x2x256xf32>
    %269 = vector.shape_cast %268 : vector<1x2x256xf32> to vector<2x256xf32>
    %270 = vector.broadcast %267 : f32 to vector<2x256xf32>
    %271 = arith.mulf %270, %269 : vector<2x256xf32>
    %272 = arith.addf %260, %271 : vector<2x256xf32>
    %c58 = arith.constant 58 : index
    %273 = memref.load %arg2[%c58] : memref<98xf32, #tpu.memory_space<smem>>
    %c1_121 = arith.constant 1 : index
    %c0_122 = arith.constant 0 : index
    %c18_123 = arith.constant 18 : index
    %274 = vector.load %arg5[%c1_121, %c0_122, %c18_123] : memref<2x2x358xf32, #tpu.memory_space<vmem>>, vector<1x2x256xf32>
    %275 = vector.shape_cast %274 : vector<1x2x256xf32> to vector<2x256xf32>
    %276 = vector.broadcast %273 : f32 to vector<2x256xf32>
    %277 = arith.mulf %276, %275 : vector<2x256xf32>
    %278 = arith.addf %266, %277 : vector<2x256xf32>
    %c65_124 = arith.constant 65 : index
    %279 = memref.load %arg2[%c65_124] : memref<98xf32, #tpu.memory_space<smem>>
    %c1_125 = arith.constant 1 : index
    %c0_126 = arith.constant 0 : index
    %c34_127 = arith.constant 34 : index
    %280 = vector.load %arg5[%c1_125, %c0_126, %c34_127] : memref<2x2x358xf32, #tpu.memory_space<vmem>>, vector<1x2x256xf32>
    %281 = vector.shape_cast %280 : vector<1x2x256xf32> to vector<2x256xf32>
    %282 = vector.broadcast %279 : f32 to vector<2x256xf32>
    %283 = arith.mulf %282, %281 : vector<2x256xf32>
    %284 = arith.addf %272, %283 : vector<2x256xf32>
    %c72 = arith.constant 72 : index
    %285 = memref.load %arg2[%c72] : memref<98xf32, #tpu.memory_space<smem>>
    %c1_128 = arith.constant 1 : index
    %c0_129 = arith.constant 0 : index
    %c50_130 = arith.constant 50 : index
    %286 = vector.load %arg5[%c1_128, %c0_129, %c50_130] : memref<2x2x358xf32, #tpu.memory_space<vmem>>, vector<1x2x256xf32>
    %287 = vector.shape_cast %286 : vector<1x2x256xf32> to vector<2x256xf32>
    %288 = vector.broadcast %285 : f32 to vector<2x256xf32>
    %289 = arith.mulf %288, %287 : vector<2x256xf32>
    %290 = arith.addf %278, %289 : vector<2x256xf32>
    %c79 = arith.constant 79 : index
    %291 = memref.load %arg2[%c79] : memref<98xf32, #tpu.memory_space<smem>>
    %c1_131 = arith.constant 1 : index
    %c0_132 = arith.constant 0 : index
    %c66_133 = arith.constant 66 : index
    %292 = vector.load %arg5[%c1_131, %c0_132, %c66_133] : memref<2x2x358xf32, #tpu.memory_space<vmem>>, vector<1x2x256xf32>
    %293 = vector.shape_cast %292 : vector<1x2x256xf32> to vector<2x256xf32>
    %294 = vector.broadcast %291 : f32 to vector<2x256xf32>
    %295 = arith.mulf %294, %293 : vector<2x256xf32>
    %296 = arith.addf %284, %295 : vector<2x256xf32>
    %c86 = arith.constant 86 : index
    %297 = memref.load %arg2[%c86] : memref<98xf32, #tpu.memory_space<smem>>
    %c1_134 = arith.constant 1 : index
    %c0_135 = arith.constant 0 : index
    %c82_136 = arith.constant 82 : index
    %298 = vector.load %arg5[%c1_134, %c0_135, %c82_136] : memref<2x2x358xf32, #tpu.memory_space<vmem>>, vector<1x2x256xf32>
    %299 = vector.shape_cast %298 : vector<1x2x256xf32> to vector<2x256xf32>
    %300 = vector.broadcast %297 : f32 to vector<2x256xf32>
    %301 = arith.mulf %300, %299 : vector<2x256xf32>
    %302 = arith.addf %290, %301 : vector<2x256xf32>
    %c93 = arith.constant 93 : index
    %303 = memref.load %arg2[%c93] : memref<98xf32, #tpu.memory_space<smem>>
    %c1_137 = arith.constant 1 : index
    %c0_138 = arith.constant 0 : index
    %c98_139 = arith.constant 98 : index
    %304 = vector.load %arg5[%c1_137, %c0_138, %c98_139] : memref<2x2x358xf32, #tpu.memory_space<vmem>>, vector<1x2x256xf32>
    %305 = vector.shape_cast %304 : vector<1x2x256xf32> to vector<2x256xf32>
    %306 = vector.broadcast %303 : f32 to vector<2x256xf32>
    %307 = arith.mulf %306, %305 : vector<2x256xf32>
    %308 = arith.addf %296, %307 : vector<2x256xf32>
    %309 = arith.addf %302, %308 : vector<2x256xf32>
    %c1_i32 = arith.constant 1 : i32
    %310 = vector.broadcast %c1_i32 : i32 to vector<1x256xi32>
    %311 = arith.cmpi sge, %33, %310 : vector<1x256xi32>
    %cst_140 = arith.constant 0.000000e+00 : f32
    %312 = vector.shape_cast %311 : vector<1x256xi1> to vector<1x256xi1>
    %313 = vector.broadcast %312 : vector<1x256xi1> to vector<2x256xi1>
    %314 = vector.broadcast %cst_140 : f32 to vector<2x256xf32>
    %315 = arith.select %313, %309, %314 : vector<2x256xi1>, vector<2x256xf32>
    %316 = arith.addf %222, %315 : vector<2x256xf32>
    %cst_141 = arith.constant 0.000000e+00 : f32
    %317 = vector.broadcast %cst_141 : f32 to vector<2x256xf32>
    %cst_142 = arith.constant 0.000000e+00 : f32
    %318 = vector.broadcast %cst_142 : f32 to vector<2x256xf32>
    %c3 = arith.constant 3 : index
    %319 = memref.load %arg2[%c3] : memref<98xf32, #tpu.memory_space<smem>>
    %c0_143 = arith.constant 0 : index
    %c0_144 = arith.constant 0 : index
    %c3_145 = arith.constant 3 : index
    %320 = vector.load %arg5[%c0_143, %c0_144, %c3_145] : memref<2x2x358xf32, #tpu.memory_space<vmem>>, vector<1x2x256xf32>
    %321 = vector.shape_cast %320 : vector<1x2x256xf32> to vector<2x256xf32>
    %322 = vector.broadcast %319 : f32 to vector<2x256xf32>
    %323 = arith.mulf %322, %321 : vector<2x256xf32>
    %324 = arith.addf %317, %323 : vector<2x256xf32>
    %c10 = arith.constant 10 : index
    %325 = memref.load %arg2[%c10] : memref<98xf32, #tpu.memory_space<smem>>
    %c0_146 = arith.constant 0 : index
    %c0_147 = arith.constant 0 : index
    %c19 = arith.constant 19 : index
    %326 = vector.load %arg5[%c0_146, %c0_147, %c19] : memref<2x2x358xf32, #tpu.memory_space<vmem>>, vector<1x2x256xf32>
    %327 = vector.shape_cast %326 : vector<1x2x256xf32> to vector<2x256xf32>
    %328 = vector.broadcast %325 : f32 to vector<2x256xf32>
    %329 = arith.mulf %328, %327 : vector<2x256xf32>
    %330 = arith.addf %318, %329 : vector<2x256xf32>
    %c17_148 = arith.constant 17 : index
    %331 = memref.load %arg2[%c17_148] : memref<98xf32, #tpu.memory_space<smem>>
    %c0_149 = arith.constant 0 : index
    %c0_150 = arith.constant 0 : index
    %c35_151 = arith.constant 35 : index
    %332 = vector.load %arg5[%c0_149, %c0_150, %c35_151] : memref<2x2x358xf32, #tpu.memory_space<vmem>>, vector<1x2x256xf32>
    %333 = vector.shape_cast %332 : vector<1x2x256xf32> to vector<2x256xf32>
    %334 = vector.broadcast %331 : f32 to vector<2x256xf32>
    %335 = arith.mulf %334, %333 : vector<2x256xf32>
    %336 = arith.addf %324, %335 : vector<2x256xf32>
    %c24 = arith.constant 24 : index
    %337 = memref.load %arg2[%c24] : memref<98xf32, #tpu.memory_space<smem>>
    %c0_152 = arith.constant 0 : index
    %c0_153 = arith.constant 0 : index
    %c51_154 = arith.constant 51 : index
    %338 = vector.load %arg5[%c0_152, %c0_153, %c51_154] : memref<2x2x358xf32, #tpu.memory_space<vmem>>, vector<1x2x256xf32>
    %339 = vector.shape_cast %338 : vector<1x2x256xf32> to vector<2x256xf32>
    %340 = vector.broadcast %337 : f32 to vector<2x256xf32>
    %341 = arith.mulf %340, %339 : vector<2x256xf32>
    %342 = arith.addf %330, %341 : vector<2x256xf32>
    %c31 = arith.constant 31 : index
    %343 = memref.load %arg2[%c31] : memref<98xf32, #tpu.memory_space<smem>>
    %c0_155 = arith.constant 0 : index
    %c0_156 = arith.constant 0 : index
    %c67 = arith.constant 67 : index
    %344 = vector.load %arg5[%c0_155, %c0_156, %c67] : memref<2x2x358xf32, #tpu.memory_space<vmem>>, vector<1x2x256xf32>
    %345 = vector.shape_cast %344 : vector<1x2x256xf32> to vector<2x256xf32>
    %346 = vector.broadcast %343 : f32 to vector<2x256xf32>
    %347 = arith.mulf %346, %345 : vector<2x256xf32>
    %348 = arith.addf %336, %347 : vector<2x256xf32>
    %c38 = arith.constant 38 : index
    %349 = memref.load %arg2[%c38] : memref<98xf32, #tpu.memory_space<smem>>
    %c0_157 = arith.constant 0 : index
    %c0_158 = arith.constant 0 : index
    %c83 = arith.constant 83 : index
    %350 = vector.load %arg5[%c0_157, %c0_158, %c83] : memref<2x2x358xf32, #tpu.memory_space<vmem>>, vector<1x2x256xf32>
    %351 = vector.shape_cast %350 : vector<1x2x256xf32> to vector<2x256xf32>
    %352 = vector.broadcast %349 : f32 to vector<2x256xf32>
    %353 = arith.mulf %352, %351 : vector<2x256xf32>
    %354 = arith.addf %342, %353 : vector<2x256xf32>
    %c45 = arith.constant 45 : index
    %355 = memref.load %arg2[%c45] : memref<98xf32, #tpu.memory_space<smem>>
    %c0_159 = arith.constant 0 : index
    %c0_160 = arith.constant 0 : index
    %c99 = arith.constant 99 : index
    %356 = vector.load %arg5[%c0_159, %c0_160, %c99] : memref<2x2x358xf32, #tpu.memory_space<vmem>>, vector<1x2x256xf32>
    %357 = vector.shape_cast %356 : vector<1x2x256xf32> to vector<2x256xf32>
    %358 = vector.broadcast %355 : f32 to vector<2x256xf32>
    %359 = arith.mulf %358, %357 : vector<2x256xf32>
    %360 = arith.addf %348, %359 : vector<2x256xf32>
    %c52 = arith.constant 52 : index
    %361 = memref.load %arg2[%c52] : memref<98xf32, #tpu.memory_space<smem>>
    %c1_161 = arith.constant 1 : index
    %c0_162 = arith.constant 0 : index
    %c3_163 = arith.constant 3 : index
    %362 = vector.load %arg5[%c1_161, %c0_162, %c3_163] : memref<2x2x358xf32, #tpu.memory_space<vmem>>, vector<1x2x256xf32>
    %363 = vector.shape_cast %362 : vector<1x2x256xf32> to vector<2x256xf32>
    %364 = vector.broadcast %361 : f32 to vector<2x256xf32>
    %365 = arith.mulf %364, %363 : vector<2x256xf32>
    %366 = arith.addf %354, %365 : vector<2x256xf32>
    %c59 = arith.constant 59 : index
    %367 = memref.load %arg2[%c59] : memref<98xf32, #tpu.memory_space<smem>>
    %c1_164 = arith.constant 1 : index
    %c0_165 = arith.constant 0 : index
    %c19_166 = arith.constant 19 : index
    %368 = vector.load %arg5[%c1_164, %c0_165, %c19_166] : memref<2x2x358xf32, #tpu.memory_space<vmem>>, vector<1x2x256xf32>
    %369 = vector.shape_cast %368 : vector<1x2x256xf32> to vector<2x256xf32>
    %370 = vector.broadcast %367 : f32 to vector<2x256xf32>
    %371 = arith.mulf %370, %369 : vector<2x256xf32>
    %372 = arith.addf %360, %371 : vector<2x256xf32>
    %c66_167 = arith.constant 66 : index
    %373 = memref.load %arg2[%c66_167] : memref<98xf32, #tpu.memory_space<smem>>
    %c1_168 = arith.constant 1 : index
    %c0_169 = arith.constant 0 : index
    %c35_170 = arith.constant 35 : index
    %374 = vector.load %arg5[%c1_168, %c0_169, %c35_170] : memref<2x2x358xf32, #tpu.memory_space<vmem>>, vector<1x2x256xf32>
    %375 = vector.shape_cast %374 : vector<1x2x256xf32> to vector<2x256xf32>
    %376 = vector.broadcast %373 : f32 to vector<2x256xf32>
    %377 = arith.mulf %376, %375 : vector<2x256xf32>
    %378 = arith.addf %366, %377 : vector<2x256xf32>
    %c73 = arith.constant 73 : index
    %379 = memref.load %arg2[%c73] : memref<98xf32, #tpu.memory_space<smem>>
    %c1_171 = arith.constant 1 : index
    %c0_172 = arith.constant 0 : index
    %c51_173 = arith.constant 51 : index
    %380 = vector.load %arg5[%c1_171, %c0_172, %c51_173] : memref<2x2x358xf32, #tpu.memory_space<vmem>>, vector<1x2x256xf32>
    %381 = vector.shape_cast %380 : vector<1x2x256xf32> to vector<2x256xf32>
    %382 = vector.broadcast %379 : f32 to vector<2x256xf32>
    %383 = arith.mulf %382, %381 : vector<2x256xf32>
    %384 = arith.addf %372, %383 : vector<2x256xf32>
    %c80_174 = arith.constant 80 : index
    %385 = memref.load %arg2[%c80_174] : memref<98xf32, #tpu.memory_space<smem>>
    %c1_175 = arith.constant 1 : index
    %c0_176 = arith.constant 0 : index
    %c67_177 = arith.constant 67 : index
    %386 = vector.load %arg5[%c1_175, %c0_176, %c67_177] : memref<2x2x358xf32, #tpu.memory_space<vmem>>, vector<1x2x256xf32>
    %387 = vector.shape_cast %386 : vector<1x2x256xf32> to vector<2x256xf32>
    %388 = vector.broadcast %385 : f32 to vector<2x256xf32>
    %389 = arith.mulf %388, %387 : vector<2x256xf32>
    %390 = arith.addf %378, %389 : vector<2x256xf32>
    %c87 = arith.constant 87 : index
    %391 = memref.load %arg2[%c87] : memref<98xf32, #tpu.memory_space<smem>>
    %c1_178 = arith.constant 1 : index
    %c0_179 = arith.constant 0 : index
    %c83_180 = arith.constant 83 : index
    %392 = vector.load %arg5[%c1_178, %c0_179, %c83_180] : memref<2x2x358xf32, #tpu.memory_space<vmem>>, vector<1x2x256xf32>
    %393 = vector.shape_cast %392 : vector<1x2x256xf32> to vector<2x256xf32>
    %394 = vector.broadcast %391 : f32 to vector<2x256xf32>
    %395 = arith.mulf %394, %393 : vector<2x256xf32>
    %396 = arith.addf %384, %395 : vector<2x256xf32>
    %c94 = arith.constant 94 : index
    %397 = memref.load %arg2[%c94] : memref<98xf32, #tpu.memory_space<smem>>
    %c1_181 = arith.constant 1 : index
    %c0_182 = arith.constant 0 : index
    %c99_183 = arith.constant 99 : index
    %398 = vector.load %arg5[%c1_181, %c0_182, %c99_183] : memref<2x2x358xf32, #tpu.memory_space<vmem>>, vector<1x2x256xf32>
    %399 = vector.shape_cast %398 : vector<1x2x256xf32> to vector<2x256xf32>
    %400 = vector.broadcast %397 : f32 to vector<2x256xf32>
    %401 = arith.mulf %400, %399 : vector<2x256xf32>
    %402 = arith.addf %390, %401 : vector<2x256xf32>
    %403 = arith.addf %396, %402 : vector<2x256xf32>
    %404 = arith.addf %316, %403 : vector<2x256xf32>
    %cst_184 = arith.constant 0.000000e+00 : f32
    %405 = vector.broadcast %cst_184 : f32 to vector<2x256xf32>
    %cst_185 = arith.constant 0.000000e+00 : f32
    %406 = vector.broadcast %cst_185 : f32 to vector<2x256xf32>
    %c4 = arith.constant 4 : index
    %407 = memref.load %arg2[%c4] : memref<98xf32, #tpu.memory_space<smem>>
    %c0_186 = arith.constant 0 : index
    %c0_187 = arith.constant 0 : index
    %c4_188 = arith.constant 4 : index
    %408 = vector.load %arg5[%c0_186, %c0_187, %c4_188] : memref<2x2x358xf32, #tpu.memory_space<vmem>>, vector<1x2x256xf32>
    %409 = vector.shape_cast %408 : vector<1x2x256xf32> to vector<2x256xf32>
    %410 = vector.broadcast %407 : f32 to vector<2x256xf32>
    %411 = arith.mulf %410, %409 : vector<2x256xf32>
    %412 = arith.addf %405, %411 : vector<2x256xf32>
    %c11 = arith.constant 11 : index
    %413 = memref.load %arg2[%c11] : memref<98xf32, #tpu.memory_space<smem>>
    %c0_189 = arith.constant 0 : index
    %c0_190 = arith.constant 0 : index
    %c20 = arith.constant 20 : index
    %414 = vector.load %arg5[%c0_189, %c0_190, %c20] : memref<2x2x358xf32, #tpu.memory_space<vmem>>, vector<1x2x256xf32>
    %415 = vector.shape_cast %414 : vector<1x2x256xf32> to vector<2x256xf32>
    %416 = vector.broadcast %413 : f32 to vector<2x256xf32>
    %417 = arith.mulf %416, %415 : vector<2x256xf32>
    %418 = arith.addf %406, %417 : vector<2x256xf32>
    %c18_191 = arith.constant 18 : index
    %419 = memref.load %arg2[%c18_191] : memref<98xf32, #tpu.memory_space<smem>>
    %c0_192 = arith.constant 0 : index
    %c0_193 = arith.constant 0 : index
    %c36_194 = arith.constant 36 : index
    %420 = vector.load %arg5[%c0_192, %c0_193, %c36_194] : memref<2x2x358xf32, #tpu.memory_space<vmem>>, vector<1x2x256xf32>
    %421 = vector.shape_cast %420 : vector<1x2x256xf32> to vector<2x256xf32>
    %422 = vector.broadcast %419 : f32 to vector<2x256xf32>
    %423 = arith.mulf %422, %421 : vector<2x256xf32>
    %424 = arith.addf %412, %423 : vector<2x256xf32>
    %c25 = arith.constant 25 : index
    %425 = memref.load %arg2[%c25] : memref<98xf32, #tpu.memory_space<smem>>
    %c0_195 = arith.constant 0 : index
    %c0_196 = arith.constant 0 : index
    %c52_197 = arith.constant 52 : index
    %426 = vector.load %arg5[%c0_195, %c0_196, %c52_197] : memref<2x2x358xf32, #tpu.memory_space<vmem>>, vector<1x2x256xf32>
    %427 = vector.shape_cast %426 : vector<1x2x256xf32> to vector<2x256xf32>
    %428 = vector.broadcast %425 : f32 to vector<2x256xf32>
    %429 = arith.mulf %428, %427 : vector<2x256xf32>
    %430 = arith.addf %418, %429 : vector<2x256xf32>
    %c32_198 = arith.constant 32 : index
    %431 = memref.load %arg2[%c32_198] : memref<98xf32, #tpu.memory_space<smem>>
    %c0_199 = arith.constant 0 : index
    %c0_200 = arith.constant 0 : index
    %c68 = arith.constant 68 : index
    %432 = vector.load %arg5[%c0_199, %c0_200, %c68] : memref<2x2x358xf32, #tpu.memory_space<vmem>>, vector<1x2x256xf32>
    %433 = vector.shape_cast %432 : vector<1x2x256xf32> to vector<2x256xf32>
    %434 = vector.broadcast %431 : f32 to vector<2x256xf32>
    %435 = arith.mulf %434, %433 : vector<2x256xf32>
    %436 = arith.addf %424, %435 : vector<2x256xf32>
    %c39 = arith.constant 39 : index
    %437 = memref.load %arg2[%c39] : memref<98xf32, #tpu.memory_space<smem>>
    %c0_201 = arith.constant 0 : index
    %c0_202 = arith.constant 0 : index
    %c84_203 = arith.constant 84 : index
    %438 = vector.load %arg5[%c0_201, %c0_202, %c84_203] : memref<2x2x358xf32, #tpu.memory_space<vmem>>, vector<1x2x256xf32>
    %439 = vector.shape_cast %438 : vector<1x2x256xf32> to vector<2x256xf32>
    %440 = vector.broadcast %437 : f32 to vector<2x256xf32>
    %441 = arith.mulf %440, %439 : vector<2x256xf32>
    %442 = arith.addf %430, %441 : vector<2x256xf32>
    %c46 = arith.constant 46 : index
    %443 = memref.load %arg2[%c46] : memref<98xf32, #tpu.memory_space<smem>>
    %c0_204 = arith.constant 0 : index
    %c0_205 = arith.constant 0 : index
    %c100 = arith.constant 100 : index
    %444 = vector.load %arg5[%c0_204, %c0_205, %c100] : memref<2x2x358xf32, #tpu.memory_space<vmem>>, vector<1x2x256xf32>
    %445 = vector.shape_cast %444 : vector<1x2x256xf32> to vector<2x256xf32>
    %446 = vector.broadcast %443 : f32 to vector<2x256xf32>
    %447 = arith.mulf %446, %445 : vector<2x256xf32>
    %448 = arith.addf %436, %447 : vector<2x256xf32>
    %c53 = arith.constant 53 : index
    %449 = memref.load %arg2[%c53] : memref<98xf32, #tpu.memory_space<smem>>
    %c1_206 = arith.constant 1 : index
    %c0_207 = arith.constant 0 : index
    %c4_208 = arith.constant 4 : index
    %450 = vector.load %arg5[%c1_206, %c0_207, %c4_208] : memref<2x2x358xf32, #tpu.memory_space<vmem>>, vector<1x2x256xf32>
    %451 = vector.shape_cast %450 : vector<1x2x256xf32> to vector<2x256xf32>
    %452 = vector.broadcast %449 : f32 to vector<2x256xf32>
    %453 = arith.mulf %452, %451 : vector<2x256xf32>
    %454 = arith.addf %442, %453 : vector<2x256xf32>
    %c60 = arith.constant 60 : index
    %455 = memref.load %arg2[%c60] : memref<98xf32, #tpu.memory_space<smem>>
    %c1_209 = arith.constant 1 : index
    %c0_210 = arith.constant 0 : index
    %c20_211 = arith.constant 20 : index
    %456 = vector.load %arg5[%c1_209, %c0_210, %c20_211] : memref<2x2x358xf32, #tpu.memory_space<vmem>>, vector<1x2x256xf32>
    %457 = vector.shape_cast %456 : vector<1x2x256xf32> to vector<2x256xf32>
    %458 = vector.broadcast %455 : f32 to vector<2x256xf32>
    %459 = arith.mulf %458, %457 : vector<2x256xf32>
    %460 = arith.addf %448, %459 : vector<2x256xf32>
    %c67_212 = arith.constant 67 : index
    %461 = memref.load %arg2[%c67_212] : memref<98xf32, #tpu.memory_space<smem>>
    %c1_213 = arith.constant 1 : index
    %c0_214 = arith.constant 0 : index
    %c36_215 = arith.constant 36 : index
    %462 = vector.load %arg5[%c1_213, %c0_214, %c36_215] : memref<2x2x358xf32, #tpu.memory_space<vmem>>, vector<1x2x256xf32>
    %463 = vector.shape_cast %462 : vector<1x2x256xf32> to vector<2x256xf32>
    %464 = vector.broadcast %461 : f32 to vector<2x256xf32>
    %465 = arith.mulf %464, %463 : vector<2x256xf32>
    %466 = arith.addf %454, %465 : vector<2x256xf32>
    %c74 = arith.constant 74 : index
    %467 = memref.load %arg2[%c74] : memref<98xf32, #tpu.memory_space<smem>>
    %c1_216 = arith.constant 1 : index
    %c0_217 = arith.constant 0 : index
    %c52_218 = arith.constant 52 : index
    %468 = vector.load %arg5[%c1_216, %c0_217, %c52_218] : memref<2x2x358xf32, #tpu.memory_space<vmem>>, vector<1x2x256xf32>
    %469 = vector.shape_cast %468 : vector<1x2x256xf32> to vector<2x256xf32>
    %470 = vector.broadcast %467 : f32 to vector<2x256xf32>
    %471 = arith.mulf %470, %469 : vector<2x256xf32>
    %472 = arith.addf %460, %471 : vector<2x256xf32>
    %c81_219 = arith.constant 81 : index
    %473 = memref.load %arg2[%c81_219] : memref<98xf32, #tpu.memory_space<smem>>
    %c1_220 = arith.constant 1 : index
    %c0_221 = arith.constant 0 : index
    %c68_222 = arith.constant 68 : index
    %474 = vector.load %arg5[%c1_220, %c0_221, %c68_222] : memref<2x2x358xf32, #tpu.memory_space<vmem>>, vector<1x2x256xf32>
    %475 = vector.shape_cast %474 : vector<1x2x256xf32> to vector<2x256xf32>
    %476 = vector.broadcast %473 : f32 to vector<2x256xf32>
    %477 = arith.mulf %476, %475 : vector<2x256xf32>
    %478 = arith.addf %466, %477 : vector<2x256xf32>
    %c88 = arith.constant 88 : index
    %479 = memref.load %arg2[%c88] : memref<98xf32, #tpu.memory_space<smem>>
    %c1_223 = arith.constant 1 : index
    %c0_224 = arith.constant 0 : index
    %c84_225 = arith.constant 84 : index
    %480 = vector.load %arg5[%c1_223, %c0_224, %c84_225] : memref<2x2x358xf32, #tpu.memory_space<vmem>>, vector<1x2x256xf32>
    %481 = vector.shape_cast %480 : vector<1x2x256xf32> to vector<2x256xf32>
    %482 = vector.broadcast %479 : f32 to vector<2x256xf32>
    %483 = arith.mulf %482, %481 : vector<2x256xf32>
    %484 = arith.addf %472, %483 : vector<2x256xf32>
    %c95 = arith.constant 95 : index
    %485 = memref.load %arg2[%c95] : memref<98xf32, #tpu.memory_space<smem>>
    %c1_226 = arith.constant 1 : index
    %c0_227 = arith.constant 0 : index
    %c100_228 = arith.constant 100 : index
    %486 = vector.load %arg5[%c1_226, %c0_227, %c100_228] : memref<2x2x358xf32, #tpu.memory_space<vmem>>, vector<1x2x256xf32>
    %487 = vector.shape_cast %486 : vector<1x2x256xf32> to vector<2x256xf32>
    %488 = vector.broadcast %485 : f32 to vector<2x256xf32>
    %489 = arith.mulf %488, %487 : vector<2x256xf32>
    %490 = arith.addf %478, %489 : vector<2x256xf32>
    %491 = arith.addf %484, %490 : vector<2x256xf32>
    %c15_i32_229 = arith.constant 15 : i32
    %492 = vector.broadcast %c15_i32_229 : i32 to vector<1x256xi32>
    %493 = arith.cmpi slt, %33, %492 : vector<1x256xi32>
    %cst_230 = arith.constant 0.000000e+00 : f32
    %494 = vector.shape_cast %493 : vector<1x256xi1> to vector<1x256xi1>
    %495 = vector.broadcast %494 : vector<1x256xi1> to vector<2x256xi1>
    %496 = vector.broadcast %cst_230 : f32 to vector<2x256xf32>
    %497 = arith.select %495, %491, %496 : vector<2x256xi1>, vector<2x256xf32>
    %498 = arith.addf %404, %497 : vector<2x256xf32>
    %cst_231 = arith.constant 0.000000e+00 : f32
    %499 = vector.broadcast %cst_231 : f32 to vector<2x256xf32>
    %cst_232 = arith.constant 0.000000e+00 : f32
    %500 = vector.broadcast %cst_232 : f32 to vector<2x256xf32>
    %c5 = arith.constant 5 : index
    %501 = memref.load %arg2[%c5] : memref<98xf32, #tpu.memory_space<smem>>
    %c0_233 = arith.constant 0 : index
    %c0_234 = arith.constant 0 : index
    %c5_235 = arith.constant 5 : index
    %502 = vector.load %arg5[%c0_233, %c0_234, %c5_235] : memref<2x2x358xf32, #tpu.memory_space<vmem>>, vector<1x2x256xf32>
    %503 = vector.shape_cast %502 : vector<1x2x256xf32> to vector<2x256xf32>
    %504 = vector.broadcast %501 : f32 to vector<2x256xf32>
    %505 = arith.mulf %504, %503 : vector<2x256xf32>
    %506 = arith.addf %499, %505 : vector<2x256xf32>
    %c12 = arith.constant 12 : index
    %507 = memref.load %arg2[%c12] : memref<98xf32, #tpu.memory_space<smem>>
    %c0_236 = arith.constant 0 : index
    %c0_237 = arith.constant 0 : index
    %c21_238 = arith.constant 21 : index
    %508 = vector.load %arg5[%c0_236, %c0_237, %c21_238] : memref<2x2x358xf32, #tpu.memory_space<vmem>>, vector<1x2x256xf32>
    %509 = vector.shape_cast %508 : vector<1x2x256xf32> to vector<2x256xf32>
    %510 = vector.broadcast %507 : f32 to vector<2x256xf32>
    %511 = arith.mulf %510, %509 : vector<2x256xf32>
    %512 = arith.addf %500, %511 : vector<2x256xf32>
    %c19_239 = arith.constant 19 : index
    %513 = memref.load %arg2[%c19_239] : memref<98xf32, #tpu.memory_space<smem>>
    %c0_240 = arith.constant 0 : index
    %c0_241 = arith.constant 0 : index
    %c37_242 = arith.constant 37 : index
    %514 = vector.load %arg5[%c0_240, %c0_241, %c37_242] : memref<2x2x358xf32, #tpu.memory_space<vmem>>, vector<1x2x256xf32>
    %515 = vector.shape_cast %514 : vector<1x2x256xf32> to vector<2x256xf32>
    %516 = vector.broadcast %513 : f32 to vector<2x256xf32>
    %517 = arith.mulf %516, %515 : vector<2x256xf32>
    %518 = arith.addf %506, %517 : vector<2x256xf32>
    %c26 = arith.constant 26 : index
    %519 = memref.load %arg2[%c26] : memref<98xf32, #tpu.memory_space<smem>>
    %c0_243 = arith.constant 0 : index
    %c0_244 = arith.constant 0 : index
    %c53_245 = arith.constant 53 : index
    %520 = vector.load %arg5[%c0_243, %c0_244, %c53_245] : memref<2x2x358xf32, #tpu.memory_space<vmem>>, vector<1x2x256xf32>
    %521 = vector.shape_cast %520 : vector<1x2x256xf32> to vector<2x256xf32>
    %522 = vector.broadcast %519 : f32 to vector<2x256xf32>
    %523 = arith.mulf %522, %521 : vector<2x256xf32>
    %524 = arith.addf %512, %523 : vector<2x256xf32>
    %c33_246 = arith.constant 33 : index
    %525 = memref.load %arg2[%c33_246] : memref<98xf32, #tpu.memory_space<smem>>
    %c0_247 = arith.constant 0 : index
    %c0_248 = arith.constant 0 : index
    %c69 = arith.constant 69 : index
    %526 = vector.load %arg5[%c0_247, %c0_248, %c69] : memref<2x2x358xf32, #tpu.memory_space<vmem>>, vector<1x2x256xf32>
    %527 = vector.shape_cast %526 : vector<1x2x256xf32> to vector<2x256xf32>
    %528 = vector.broadcast %525 : f32 to vector<2x256xf32>
    %529 = arith.mulf %528, %527 : vector<2x256xf32>
    %530 = arith.addf %518, %529 : vector<2x256xf32>
    %c40 = arith.constant 40 : index
    %531 = memref.load %arg2[%c40] : memref<98xf32, #tpu.memory_space<smem>>
    %c0_249 = arith.constant 0 : index
    %c0_250 = arith.constant 0 : index
    %c85_251 = arith.constant 85 : index
    %532 = vector.load %arg5[%c0_249, %c0_250, %c85_251] : memref<2x2x358xf32, #tpu.memory_space<vmem>>, vector<1x2x256xf32>
    %533 = vector.shape_cast %532 : vector<1x2x256xf32> to vector<2x256xf32>
    %534 = vector.broadcast %531 : f32 to vector<2x256xf32>
    %535 = arith.mulf %534, %533 : vector<2x256xf32>
    %536 = arith.addf %524, %535 : vector<2x256xf32>
    %c47 = arith.constant 47 : index
    %537 = memref.load %arg2[%c47] : memref<98xf32, #tpu.memory_space<smem>>
    %c0_252 = arith.constant 0 : index
    %c0_253 = arith.constant 0 : index
    %c101 = arith.constant 101 : index
    %538 = vector.load %arg5[%c0_252, %c0_253, %c101] : memref<2x2x358xf32, #tpu.memory_space<vmem>>, vector<1x2x256xf32>
    %539 = vector.shape_cast %538 : vector<1x2x256xf32> to vector<2x256xf32>
    %540 = vector.broadcast %537 : f32 to vector<2x256xf32>
    %541 = arith.mulf %540, %539 : vector<2x256xf32>
    %542 = arith.addf %530, %541 : vector<2x256xf32>
    %c54 = arith.constant 54 : index
    %543 = memref.load %arg2[%c54] : memref<98xf32, #tpu.memory_space<smem>>
    %c1_254 = arith.constant 1 : index
    %c0_255 = arith.constant 0 : index
    %c5_256 = arith.constant 5 : index
    %544 = vector.load %arg5[%c1_254, %c0_255, %c5_256] : memref<2x2x358xf32, #tpu.memory_space<vmem>>, vector<1x2x256xf32>
    %545 = vector.shape_cast %544 : vector<1x2x256xf32> to vector<2x256xf32>
    %546 = vector.broadcast %543 : f32 to vector<2x256xf32>
    %547 = arith.mulf %546, %545 : vector<2x256xf32>
    %548 = arith.addf %536, %547 : vector<2x256xf32>
    %c61 = arith.constant 61 : index
    %549 = memref.load %arg2[%c61] : memref<98xf32, #tpu.memory_space<smem>>
    %c1_257 = arith.constant 1 : index
    %c0_258 = arith.constant 0 : index
    %c21_259 = arith.constant 21 : index
    %550 = vector.load %arg5[%c1_257, %c0_258, %c21_259] : memref<2x2x358xf32, #tpu.memory_space<vmem>>, vector<1x2x256xf32>
    %551 = vector.shape_cast %550 : vector<1x2x256xf32> to vector<2x256xf32>
    %552 = vector.broadcast %549 : f32 to vector<2x256xf32>
    %553 = arith.mulf %552, %551 : vector<2x256xf32>
    %554 = arith.addf %542, %553 : vector<2x256xf32>
    %c68_260 = arith.constant 68 : index
    %555 = memref.load %arg2[%c68_260] : memref<98xf32, #tpu.memory_space<smem>>
    %c1_261 = arith.constant 1 : index
    %c0_262 = arith.constant 0 : index
    %c37_263 = arith.constant 37 : index
    %556 = vector.load %arg5[%c1_261, %c0_262, %c37_263] : memref<2x2x358xf32, #tpu.memory_space<vmem>>, vector<1x2x256xf32>
    %557 = vector.shape_cast %556 : vector<1x2x256xf32> to vector<2x256xf32>
    %558 = vector.broadcast %555 : f32 to vector<2x256xf32>
    %559 = arith.mulf %558, %557 : vector<2x256xf32>
    %560 = arith.addf %548, %559 : vector<2x256xf32>
    %c75 = arith.constant 75 : index
    %561 = memref.load %arg2[%c75] : memref<98xf32, #tpu.memory_space<smem>>
    %c1_264 = arith.constant 1 : index
    %c0_265 = arith.constant 0 : index
    %c53_266 = arith.constant 53 : index
    %562 = vector.load %arg5[%c1_264, %c0_265, %c53_266] : memref<2x2x358xf32, #tpu.memory_space<vmem>>, vector<1x2x256xf32>
    %563 = vector.shape_cast %562 : vector<1x2x256xf32> to vector<2x256xf32>
    %564 = vector.broadcast %561 : f32 to vector<2x256xf32>
    %565 = arith.mulf %564, %563 : vector<2x256xf32>
    %566 = arith.addf %554, %565 : vector<2x256xf32>
    %c82_267 = arith.constant 82 : index
    %567 = memref.load %arg2[%c82_267] : memref<98xf32, #tpu.memory_space<smem>>
    %c1_268 = arith.constant 1 : index
    %c0_269 = arith.constant 0 : index
    %c69_270 = arith.constant 69 : index
    %568 = vector.load %arg5[%c1_268, %c0_269, %c69_270] : memref<2x2x358xf32, #tpu.memory_space<vmem>>, vector<1x2x256xf32>
    %569 = vector.shape_cast %568 : vector<1x2x256xf32> to vector<2x256xf32>
    %570 = vector.broadcast %567 : f32 to vector<2x256xf32>
    %571 = arith.mulf %570, %569 : vector<2x256xf32>
    %572 = arith.addf %560, %571 : vector<2x256xf32>
    %c89 = arith.constant 89 : index
    %573 = memref.load %arg2[%c89] : memref<98xf32, #tpu.memory_space<smem>>
    %c1_271 = arith.constant 1 : index
    %c0_272 = arith.constant 0 : index
    %c85_273 = arith.constant 85 : index
    %574 = vector.load %arg5[%c1_271, %c0_272, %c85_273] : memref<2x2x358xf32, #tpu.memory_space<vmem>>, vector<1x2x256xf32>
    %575 = vector.shape_cast %574 : vector<1x2x256xf32> to vector<2x256xf32>
    %576 = vector.broadcast %573 : f32 to vector<2x256xf32>
    %577 = arith.mulf %576, %575 : vector<2x256xf32>
    %578 = arith.addf %566, %577 : vector<2x256xf32>
    %c96_274 = arith.constant 96 : index
    %579 = memref.load %arg2[%c96_274] : memref<98xf32, #tpu.memory_space<smem>>
    %c1_275 = arith.constant 1 : index
    %c0_276 = arith.constant 0 : index
    %c101_277 = arith.constant 101 : index
    %580 = vector.load %arg5[%c1_275, %c0_276, %c101_277] : memref<2x2x358xf32, #tpu.memory_space<vmem>>, vector<1x2x256xf32>
    %581 = vector.shape_cast %580 : vector<1x2x256xf32> to vector<2x256xf32>
    %582 = vector.broadcast %579 : f32 to vector<2x256xf32>
    %583 = arith.mulf %582, %581 : vector<2x256xf32>
    %584 = arith.addf %572, %583 : vector<2x256xf32>
    %585 = arith.addf %578, %584 : vector<2x256xf32>
    %c14_i32 = arith.constant 14 : i32
    %586 = vector.broadcast %c14_i32 : i32 to vector<1x256xi32>
    %587 = arith.cmpi slt, %33, %586 : vector<1x256xi32>
    %cst_278 = arith.constant 0.000000e+00 : f32
    %588 = vector.shape_cast %587 : vector<1x256xi1> to vector<1x256xi1>
    %589 = vector.broadcast %588 : vector<1x256xi1> to vector<2x256xi1>
    %590 = vector.broadcast %cst_278 : f32 to vector<2x256xf32>
    %591 = arith.select %589, %585, %590 : vector<2x256xi1>, vector<2x256xf32>
    %592 = arith.addf %498, %591 : vector<2x256xf32>
    %cst_279 = arith.constant 0.000000e+00 : f32
    %593 = vector.broadcast %cst_279 : f32 to vector<2x256xf32>
    %cst_280 = arith.constant 0.000000e+00 : f32
    %594 = vector.broadcast %cst_280 : f32 to vector<2x256xf32>
    %c6 = arith.constant 6 : index
    %595 = memref.load %arg2[%c6] : memref<98xf32, #tpu.memory_space<smem>>
    %c0_281 = arith.constant 0 : index
    %c0_282 = arith.constant 0 : index
    %c6_283 = arith.constant 6 : index
    %596 = vector.load %arg5[%c0_281, %c0_282, %c6_283] : memref<2x2x358xf32, #tpu.memory_space<vmem>>, vector<1x2x256xf32>
    %597 = vector.shape_cast %596 : vector<1x2x256xf32> to vector<2x256xf32>
    %598 = vector.broadcast %595 : f32 to vector<2x256xf32>
    %599 = arith.mulf %598, %597 : vector<2x256xf32>
    %600 = arith.addf %593, %599 : vector<2x256xf32>
    %c13 = arith.constant 13 : index
    %601 = memref.load %arg2[%c13] : memref<98xf32, #tpu.memory_space<smem>>
    %c0_284 = arith.constant 0 : index
    %c0_285 = arith.constant 0 : index
    %c22_286 = arith.constant 22 : index
    %602 = vector.load %arg5[%c0_284, %c0_285, %c22_286] : memref<2x2x358xf32, #tpu.memory_space<vmem>>, vector<1x2x256xf32>
    %603 = vector.shape_cast %602 : vector<1x2x256xf32> to vector<2x256xf32>
    %604 = vector.broadcast %601 : f32 to vector<2x256xf32>
    %605 = arith.mulf %604, %603 : vector<2x256xf32>
    %606 = arith.addf %594, %605 : vector<2x256xf32>
    %c20_287 = arith.constant 20 : index
    %607 = memref.load %arg2[%c20_287] : memref<98xf32, #tpu.memory_space<smem>>
    %c0_288 = arith.constant 0 : index
    %c0_289 = arith.constant 0 : index
    %c38_290 = arith.constant 38 : index
    %608 = vector.load %arg5[%c0_288, %c0_289, %c38_290] : memref<2x2x358xf32, #tpu.memory_space<vmem>>, vector<1x2x256xf32>
    %609 = vector.shape_cast %608 : vector<1x2x256xf32> to vector<2x256xf32>
    %610 = vector.broadcast %607 : f32 to vector<2x256xf32>
    %611 = arith.mulf %610, %609 : vector<2x256xf32>
    %612 = arith.addf %600, %611 : vector<2x256xf32>
    %c27 = arith.constant 27 : index
    %613 = memref.load %arg2[%c27] : memref<98xf32, #tpu.memory_space<smem>>
    %c0_291 = arith.constant 0 : index
    %c0_292 = arith.constant 0 : index
    %c54_293 = arith.constant 54 : index
    %614 = vector.load %arg5[%c0_291, %c0_292, %c54_293] : memref<2x2x358xf32, #tpu.memory_space<vmem>>, vector<1x2x256xf32>
    %615 = vector.shape_cast %614 : vector<1x2x256xf32> to vector<2x256xf32>
    %616 = vector.broadcast %613 : f32 to vector<2x256xf32>
    %617 = arith.mulf %616, %615 : vector<2x256xf32>
    %618 = arith.addf %606, %617 : vector<2x256xf32>
    %c34_294 = arith.constant 34 : index
    %619 = memref.load %arg2[%c34_294] : memref<98xf32, #tpu.memory_space<smem>>
    %c0_295 = arith.constant 0 : index
    %c0_296 = arith.constant 0 : index
    %c70_297 = arith.constant 70 : index
    %620 = vector.load %arg5[%c0_295, %c0_296, %c70_297] : memref<2x2x358xf32, #tpu.memory_space<vmem>>, vector<1x2x256xf32>
    %621 = vector.shape_cast %620 : vector<1x2x256xf32> to vector<2x256xf32>
    %622 = vector.broadcast %619 : f32 to vector<2x256xf32>
    %623 = arith.mulf %622, %621 : vector<2x256xf32>
    %624 = arith.addf %612, %623 : vector<2x256xf32>
    %c41 = arith.constant 41 : index
    %625 = memref.load %arg2[%c41] : memref<98xf32, #tpu.memory_space<smem>>
    %c0_298 = arith.constant 0 : index
    %c0_299 = arith.constant 0 : index
    %c86_300 = arith.constant 86 : index
    %626 = vector.load %arg5[%c0_298, %c0_299, %c86_300] : memref<2x2x358xf32, #tpu.memory_space<vmem>>, vector<1x2x256xf32>
    %627 = vector.shape_cast %626 : vector<1x2x256xf32> to vector<2x256xf32>
    %628 = vector.broadcast %625 : f32 to vector<2x256xf32>
    %629 = arith.mulf %628, %627 : vector<2x256xf32>
    %630 = arith.addf %618, %629 : vector<2x256xf32>
    %c48_301 = arith.constant 48 : index
    %631 = memref.load %arg2[%c48_301] : memref<98xf32, #tpu.memory_space<smem>>
    %c0_302 = arith.constant 0 : index
    %c0_303 = arith.constant 0 : index
    %c102 = arith.constant 102 : index
    %632 = vector.load %arg5[%c0_302, %c0_303, %c102] : memref<2x2x358xf32, #tpu.memory_space<vmem>>, vector<1x2x256xf32>
    %633 = vector.shape_cast %632 : vector<1x2x256xf32> to vector<2x256xf32>
    %634 = vector.broadcast %631 : f32 to vector<2x256xf32>
    %635 = arith.mulf %634, %633 : vector<2x256xf32>
    %636 = arith.addf %624, %635 : vector<2x256xf32>
    %c55 = arith.constant 55 : index
    %637 = memref.load %arg2[%c55] : memref<98xf32, #tpu.memory_space<smem>>
    %c1_304 = arith.constant 1 : index
    %c0_305 = arith.constant 0 : index
    %c6_306 = arith.constant 6 : index
    %638 = vector.load %arg5[%c1_304, %c0_305, %c6_306] : memref<2x2x358xf32, #tpu.memory_space<vmem>>, vector<1x2x256xf32>
    %639 = vector.shape_cast %638 : vector<1x2x256xf32> to vector<2x256xf32>
    %640 = vector.broadcast %637 : f32 to vector<2x256xf32>
    %641 = arith.mulf %640, %639 : vector<2x256xf32>
    %642 = arith.addf %630, %641 : vector<2x256xf32>
    %c62 = arith.constant 62 : index
    %643 = memref.load %arg2[%c62] : memref<98xf32, #tpu.memory_space<smem>>
    %c1_307 = arith.constant 1 : index
    %c0_308 = arith.constant 0 : index
    %c22_309 = arith.constant 22 : index
    %644 = vector.load %arg5[%c1_307, %c0_308, %c22_309] : memref<2x2x358xf32, #tpu.memory_space<vmem>>, vector<1x2x256xf32>
    %645 = vector.shape_cast %644 : vector<1x2x256xf32> to vector<2x256xf32>
    %646 = vector.broadcast %643 : f32 to vector<2x256xf32>
    %647 = arith.mulf %646, %645 : vector<2x256xf32>
    %648 = arith.addf %636, %647 : vector<2x256xf32>
    %c69_310 = arith.constant 69 : index
    %649 = memref.load %arg2[%c69_310] : memref<98xf32, #tpu.memory_space<smem>>
    %c1_311 = arith.constant 1 : index
    %c0_312 = arith.constant 0 : index
    %c38_313 = arith.constant 38 : index
    %650 = vector.load %arg5[%c1_311, %c0_312, %c38_313] : memref<2x2x358xf32, #tpu.memory_space<vmem>>, vector<1x2x256xf32>
    %651 = vector.shape_cast %650 : vector<1x2x256xf32> to vector<2x256xf32>
    %652 = vector.broadcast %649 : f32 to vector<2x256xf32>
    %653 = arith.mulf %652, %651 : vector<2x256xf32>
    %654 = arith.addf %642, %653 : vector<2x256xf32>
    %c76 = arith.constant 76 : index
    %655 = memref.load %arg2[%c76] : memref<98xf32, #tpu.memory_space<smem>>
    %c1_314 = arith.constant 1 : index
    %c0_315 = arith.constant 0 : index
    %c54_316 = arith.constant 54 : index
    %656 = vector.load %arg5[%c1_314, %c0_315, %c54_316] : memref<2x2x358xf32, #tpu.memory_space<vmem>>, vector<1x2x256xf32>
    %657 = vector.shape_cast %656 : vector<1x2x256xf32> to vector<2x256xf32>
    %658 = vector.broadcast %655 : f32 to vector<2x256xf32>
    %659 = arith.mulf %658, %657 : vector<2x256xf32>
    %660 = arith.addf %648, %659 : vector<2x256xf32>
    %c83_317 = arith.constant 83 : index
    %661 = memref.load %arg2[%c83_317] : memref<98xf32, #tpu.memory_space<smem>>
    %c1_318 = arith.constant 1 : index
    %c0_319 = arith.constant 0 : index
    %c70_320 = arith.constant 70 : index
    %662 = vector.load %arg5[%c1_318, %c0_319, %c70_320] : memref<2x2x358xf32, #tpu.memory_space<vmem>>, vector<1x2x256xf32>
    %663 = vector.shape_cast %662 : vector<1x2x256xf32> to vector<2x256xf32>
    %664 = vector.broadcast %661 : f32 to vector<2x256xf32>
    %665 = arith.mulf %664, %663 : vector<2x256xf32>
    %666 = arith.addf %654, %665 : vector<2x256xf32>
    %c90 = arith.constant 90 : index
    %667 = memref.load %arg2[%c90] : memref<98xf32, #tpu.memory_space<smem>>
    %c1_321 = arith.constant 1 : index
    %c0_322 = arith.constant 0 : index
    %c86_323 = arith.constant 86 : index
    %668 = vector.load %arg5[%c1_321, %c0_322, %c86_323] : memref<2x2x358xf32, #tpu.memory_space<vmem>>, vector<1x2x256xf32>
    %669 = vector.shape_cast %668 : vector<1x2x256xf32> to vector<2x256xf32>
    %670 = vector.broadcast %667 : f32 to vector<2x256xf32>
    %671 = arith.mulf %670, %669 : vector<2x256xf32>
    %672 = arith.addf %660, %671 : vector<2x256xf32>
    %c97_324 = arith.constant 97 : index
    %673 = memref.load %arg2[%c97_324] : memref<98xf32, #tpu.memory_space<smem>>
    %c1_325 = arith.constant 1 : index
    %c0_326 = arith.constant 0 : index
    %c102_327 = arith.constant 102 : index
    %674 = vector.load %arg5[%c1_325, %c0_326, %c102_327] : memref<2x2x358xf32, #tpu.memory_space<vmem>>, vector<1x2x256xf32>
    %675 = vector.shape_cast %674 : vector<1x2x256xf32> to vector<2x256xf32>
    %676 = vector.broadcast %673 : f32 to vector<2x256xf32>
    %677 = arith.mulf %676, %675 : vector<2x256xf32>
    %678 = arith.addf %666, %677 : vector<2x256xf32>
    %679 = arith.addf %672, %678 : vector<2x256xf32>
    %c13_i32 = arith.constant 13 : i32
    %680 = vector.broadcast %c13_i32 : i32 to vector<1x256xi32>
    %681 = arith.cmpi slt, %33, %680 : vector<1x256xi32>
    %cst_328 = arith.constant 0.000000e+00 : f32
    %682 = vector.shape_cast %681 : vector<1x256xi1> to vector<1x256xi1>
    %683 = vector.broadcast %682 : vector<1x256xi1> to vector<2x256xi1>
    %684 = vector.broadcast %cst_328 : f32 to vector<2x256xf32>
    %685 = arith.select %683, %679, %684 : vector<2x256xi1>, vector<2x256xf32>
    %686 = arith.addf %592, %685 : vector<2x256xf32>
    %c0_329 = arith.constant 0 : index
    %687 = memref.load %arg3[%c0_329] : memref<1xf32, #tpu.memory_space<smem>>
    %688 = vector.broadcast %687 : f32 to vector<2x256xf32>
    %689 = arith.addf %686, %688 : vector<2x256xf32>
    %690 = arith.negf %689 : vector<2x256xf32>
    %691 = math.exp %690 : vector<2x256xf32>
    %cst_330 = arith.constant 1.000000e+00 : f32
    %692 = vector.broadcast %cst_330 : f32 to vector<2x256xf32>
    %693 = arith.addf %692, %691 : vector<2x256xf32>
    %694 = arith.divf %692, %693 : vector<2x256xf32>
    %695 = vector.shape_cast %694 : vector<2x256xf32> to vector<2x1x256xf32>
    %696 = vector.shape_cast %695 : vector<2x1x256xf32> to vector<2x1x256xf32>
    %697 = vector.broadcast %696 : vector<2x1x256xf32> to vector<2x4x256xf32>
    %c0_331 = arith.constant 0 : index
    %c0_332 = arith.constant 0 : index
    %c0_333 = arith.constant 0 : index
    %698 = vector.load %arg1[%c0_331, %c0_332, %c0_333] : memref<2x4x256xf32, #tpu.memory_space<vmem>>, vector<2x4x256xf32>
    %699 = arith.mulf %698, %697 : vector<2x4x256xf32>
    %c0_334 = arith.constant 0 : index
    %c0_335 = arith.constant 0 : index
    %c0_336 = arith.constant 0 : index
    %700 = vector.load %arg4[%c0_334, %c0_335, %c0_336] : memref<2x4x256xf32, #tpu.memory_space<vmem>>, vector<2x4x256xf32>
    tpu.vector_store %arg4[%c0_334, %c0_335, %c0_336], %699 {strides = array<i32>} : memref<2x4x256xf32, #tpu.memory_space<vmem>>, vector<2x4x256xf32>,
    return
  }
  func.func @transform_0(%arg0: i32) -> (i32, i32, i32) {
    %c0_i32 = arith.constant 0 : i32
    %c0_i32_0 = arith.constant 0 : i32
    %c0_i32_1 = arith.constant 0 : i32
    return %arg0, %c0_i32, %c0_i32_0 : i32, i32, i32
  }
  func.func @transform_1(%arg0: i32) -> i32 {
    %c0_i32 = arith.constant 0 : i32
    %c0_i32_0 = arith.constant 0 : i32
    return %c0_i32 : i32
  }
  func.func @transform_2(%arg0: i32) -> i32 {
    %c0_i32 = arith.constant 0 : i32
    %c0_i32_0 = arith.constant 0 : i32
    return %c0_i32 : i32
  }
  func.func @transform_3(%arg0: i32) -> (i32, i32, i32) {
    %c0_i32 = arith.constant 0 : i32
    %c0_i32_0 = arith.constant 0 : i32
    %c0_i32_1 = arith.constant 0 : i32
    return %arg0, %c0_i32, %c0_i32_0 : i32, i32, i32
  }
}

</mosaic_0001>

<bundles_post_ra>
// kernel: tpu_custom_call.1
= control target key start
LH: loop header
LB: loop body
LE: loop exit
PB: predicated region body
PF: predicated region fallthrough
CT: control target
= control target key end

     0   :  { %9 = vsyncpa [#allocation5], 0  ;;  %s2327_s0 = inlined_call_operand.hbm [shape: f32[2,4,256], index: 0, kind: input, shape index: {}]   ;;  %s2328_s1 = inlined_call_operand.vmem [shape: f32[98], index: 1, kind: input, shape index: {}]   ;;  %s2329_s2 = inlined_call_operand.<no memory space> [shape: f32[1], index: 2, kind: input, shape index: {}]   ;;  %s2330_s3 = inlined_call_operand.hbm [shape: f32[2,4,256], index: 3, kind: output, shape index: {}]  }
   0x1   :  { %10 = vsyncpa [#allocation7], 0 }
   0x2   :  { %11 = vsyncpa [#allocation6], 0  ;;  %s1648_s12 = smov [#allocation4]   ;;  %s30_s16 = sshll.u32 %s2328_s1, 4  ;;  %s31_s16 = int_to_ptr.vmem [resolvable:$true] %s30_s16 }
   0x3   :  { %s17_s13 = sshll.u32 %s1648_s12, 4  ;;  %s1586_s19 = scalar_lea.hbm %s2327_s0, 256  ;;  %s18_s13 = int_to_ptr.vmem [resolvable:$true] %s17_s13 }
   0x4   :  { %p1587_p0 = scmp.ne.s32.totalorder %s2327_s0, %s1586_s19  ;;  %p1590_p1 = scmp.lt.u32.totalorder %s1586_s19, %s2327_s0 }
   0x6   :  { %p1592_p2 = pnand %p1590_p1, %p1587_p0 }
   0x8   :  { %1595 = shalt.err (!%p1592_p2)
}
   0x9   :  { %s1596_s24 = scalar_lea.vmem %s18_s13, 256  ;;  %p1601_p4 = scmp.lt.s32.totalorder %s18_s13, %s18_s13 }
   0xa   :  { %p1597_p3 = scmp.ne.s32.totalorder %s18_s13, %s1596_s24  ;;  %p1602_p5 = scmp.lt.s32.totalorder %s1596_s24, %s1596_s24 }
   0xc   :  { %p1603_p6 = por %p1602_p5, %p1601_p4 }
   0xe   :  { %p1604_p7 = pnand %p1603_p6, %p1597_p3 }
  0x10   :  { %1607 = shalt.err (!%p1604_p7)
}
  0x11   :  { %s1649_s1 = smov 128   ;;  %s1650_s25 = smov 8  }
  0x12   :  { %23 = dma.hbm_to_vmem [thread:$0]  %s2327_s0, 256, %s18_s13, [#allocation5], %s1649_s1, %s1649_s1, %s1650_s25  }
  0x13   :  { %s1608_s28 = scalar_lea.vmem %s31_s16, 16  ;;  %p1613_p9 = scmp.lt.s32.totalorder %s31_s16, %s31_s16 }
  0x14   :  { %p1609_p8 = scmp.ne.s32.totalorder %s31_s16, %s1608_s28  ;;  %p1614_p10 = scmp.lt.s32.totalorder %s1608_s28, %s1608_s28 }
  0x16   :  { %p1615_p11 = por %p1614_p10, %p1613_p9 }
  0x18   :  { %p1616_p12 = pnand %p1615_p11, %p1609_p8 }
  0x1a   :  { %1619 = shalt.err (!%p1616_p12)
}
  0x1b   :  { %s1651_s29 = smov [#allocation8]  }
  0x1c   :  { %33 = dma.vmem_to_smem %s31_s16, 16, %s1651_s29, [#allocation7]  }
  0x1d   :  { %1642 = dma.done.wait [#allocation5], 256  }
  0x1e   :  { %1643 = vsyncadd [#allocation5], 4294967040 }
  0x1f   :  { %1644 = dma.done.wait [#allocation7], 16  }
  0x20   :  { %1645 = vsyncadd [#allocation7], 4294967280 }
  0x21   :  { %42 = sfence }
  0x22   :  { %v49_v0 = vld [vmem:[#allocation4] sm:$0xff]  ;;  %v50_v1 = vld [vmem:[#allocation4 + $0x8] sm:$0xff]  ;;  %v2331_v2 = vlaneseq  ;;  %v1652_v9 = vmov 1983009808   ;;  %vm43_vm0 = vcmask 410624   ;;  %v1653_v31 = vmov 0.0  }
  0x23   :  { %v55_v3 = vrot.slane %v49_v0, 5  ;;  %v57_v4 = vrot.slane %v50_v1, 5  ;;  %v65_v5 = vrot.slane %v49_v0, 6  ;;  %v67_v6 = vrot.slane %v50_v1, 6  ;;  %45 = vst.msk [vmem:[#allocation2 + $0x6] sm:$0x3] %vm43_vm0, %v1653_v31 }
  0x24   :  { %v75_v7 = vrot.slane %v49_v0, 7  ;;  %v77_v8 = vrot.slane %v50_v1, 7  ;;  %v90_v10 = vunpack.c.l.s4 %v1652_v9  ;;  %v1709_v11 = vshrl.u32 %v2331_v2, 7  ;;  %44 = vst.msk [vmem:[#allocation2] sm:$0x3] %vm43_vm0, %v1653_v31  ;;  %s1654_s0 = smov 51  }
  0x25   :  { %v56_v12 = vrot.slane %v55_v3, 4  ;;  %v58_v13 = vrot.slane %v57_v4, 4  ;;  %v66_v14 = vrot.slane %v65_v5, 4  ;;  %v68_v15 = vrot.slane %v67_v6, 4  ;;  %s1479_s30 = sld [smem:[#allocation8 + $0x40]]  ;;  %s1477_s4 = sld [smem:[#allocation8 + $0x32]] }
  0x26   :  { %2343 = vst [vmem:[#allocation13_spill] sm:$0xff] %v1709_v11  ;;  %v76_v16 = vrot.slane %v75_v7, 4  ;;  %v91_v17 = vunpack.c.0.s8 %v90_v10  ;;  %v78_v20 = vrot.slane %v77_v8, 4  ;;  %vm46_vm1 = vcmask 828824   ;;  %s1481_s5 = sld [smem:[#allocation8 + $0x4e]]  ;;  %s1491_s6 = sld [smem:[#allocation8 + $0x33]] }
  0x27   :  { %v63_v18 = vmax.f32 %v49_v0, %v56_v12  ;;  %v64_v19 = vmax.f32 %v50_v1, %v58_v13  ;;  %v61_v21 = vadd.f32 %v56_v12, %v49_v0  ;;  %v62_v22 = vadd.f32 %v58_v13, %v50_v1  ;;  %48 = vst.msk [vmem:[#allocation2 + $0xa] sm:$0x3] %vm46_vm1, %v1653_v31  ;;  %s1505_s7 = sld [smem:[#allocation8 + $0x34]]  ;;  %s1493_s8 = sld [smem:[#allocation8 + $0x41]] }
  0x28   :  { %v1712_v25 = vsub.s32 %v91_v17, %v1709_v11  ;;  %47 = vst.msk [vmem:[#allocation2 + $0x4] sm:$0x3] %vm46_vm1, %v1653_v31  ;;  %vm108_vm2 = vcmask 1041409   ;;  %vm110_vm3 = vcmask 1043459   ;;  %vm112_vm4 = vcmask 1045509   ;;  %s1495_s9 = sld [smem:[#allocation8 + $0x4f]] }
  0x29   :  { %v73_v23 = vmax.f32 %v63_v18, %v66_v14  ;;  %v74_v24 = vmax.f32 %v64_v19, %v68_v15  ;;  %v71_v26 = vadd.f32 %v66_v14, %v61_v21  ;;  %v72_v27 = vadd.f32 %v68_v15, %v62_v22  ;;  %s1483_s10 = sld [smem:[#allocation8 + $0x5c]]  ;;  %s1655_s11 = smov 112  }
  0x2a   :  { %2344 = vst [vmem:[#allocation14_spill] sm:$0xff] %v1712_v25  ;;  %vm114_vm5 = vcmask 1047559   ;;  %vm122_vm6 = vcmask 1041816   ;;  %vm123_vm7 = vcmask 1043458   ;;  %vm125_vm9 = vcmask 414724   ;;  %s1656_s12 = smov 16  }
  0x2b   :  { %v83_v28 = vmax.f32 %v73_v23, %v76_v16  ;;  %v84_v29 = vmax.f32 %v74_v24, %v78_v20  ;;  %v81_v30 = vadd.f32 %v76_v16, %v71_v26  ;;  %v82_v32 = vadd.f32 %v78_v20, %v72_v27  ;;  %vm124_vm8 = vmor %vm123_vm7, %vm122_vm6  ;;  %s1507_s13 = sld [smem:[#allocation8 + $0x42]]  ;;  %s1519_s14 = sld [smem:[#allocation8 + $0x35]] }
  0x2c   :  { %vm119_vm10 = vcmask 416768   ;;  %vm126_vm11 = vmor %vm125_vm9, %vm124_vm8  ;;  %v411_v55 = vstv %s1479_s30  ;;  %v391_v56 = vstv %s1477_s4  ;;  %v431_v60 = vstv %s1481_s5  ;;  %s1657_s15 = smov 80   ;;  %s1521_s16 = sld [smem:[#allocation8 + $0x43]] }
  0x2d   :  { %v136_v33 = vrot.slane %v83_v28, %v1712_v25  ;;  %v143_v34 = vrot.slane %v84_v29, %v1712_v25  ;;  %v85_v35 = vmul.f32 0.25, %v81_v30  ;;  %v86_v36 = vmul.f32 0.25, %v82_v32  ;;  %s1497_s17 = sld [smem:[#allocation8 + $0x5d]]  ;;  %s1523_s18 = sld [smem:[#allocation8 + $0x51]] }
  0x2e   :  { %v566_v62 = vstv %s1491_s6  ;;  %v741_v3 = vstv %s1505_s7  ;;  %v586_v4 = vstv %s1493_s8  ;;  %v606_v7 = vstv %s1495_s9  ;;  %s1533_s19 = sld [smem:[#allocation8 + $0x36]]  ;;  %s1658_s20 = smov 48  }
  0x2f   :  { %v146_v37 = vrot.slane %v143_v34, 7  ;;  %v95_v38 = vrot.slane %v85_v35, %v1712_v25  ;;  %v102_v39 = vrot.slane %v86_v36, %v1712_v25  ;;  %v451_v8 = vstv %s1483_s10  ;;  %s1547_s21 = sld [smem:[#allocation8 + $0x37]]  ;;  %s1509_s22 = sld [smem:[#allocation8 + $0x50]] }
  0x30   :  { %s1525_s23 = sld [smem:[#allocation8 + $0x5f]]  ;;  %s1535_s24 = sld [smem:[#allocation8 + $0x44]]  ;;  %vm180_vm12 = vcmask 785408   ;;  %vm246_vm13 = vcmask 916480   ;;  %vm201_vm14 = vcmask 523264   ;;  %vm234_vm15 = vcmask 130048  }
  0x31   :  { %v147_v40 = vsel %vm108_vm2, %v146_v37, %v136_v33  ;;  %v107_v42 = vrot.slane %v102_v39, 7  ;;  %v761_v12 = vstv %s1507_s13  ;;  %v908_v14 = vstv %s1519_s14  ;;  %s1549_s26 = sld [smem:[#allocation8 + $0x45]]  ;;  %s1511_s27 = sld [smem:[#allocation8 + $0x5e]] }
  0x32   :  { %v148_v41 = vsel %vm110_vm3, %v146_v37, %v147_v40  ;;  %v928_v17 = vstv %s1521_s16  ;;  %s1551_s28 = sld [smem:[#allocation8 + $0x53]]  ;;  %s1537_s29 = sld [smem:[#allocation8 + $0x52]]  ;;  %vm267_vm0 = vcmask 654336   ;;  %vm288_vm1 = vcmask 392192  }
  0x33   :  { %v149_v43 = vsel %vm112_vm4, %v146_v37, %v148_v41  ;;  %v109_v45 = vsel %vm108_vm2, %v107_v42, %v95_v38  ;;  %v626_v18 = vstv %s1497_s17  ;;  %v948_v21 = vstv %s1523_s18  ;;  %s1465_s30 = sld [smem:[#allocation8 + $0x3f]]  ;;  %s1553_s4 = sld [smem:[#allocation8 + $0x61]] }
  0x34   :  { %v150_v44 = vsel %vm114_vm5, %v146_v37, %v149_v43  ;;  %v111_v46 = vsel %vm110_vm3, %v107_v42, %v109_v45  ;;  %v1083_v23 = vstv %s1533_s19  ;;  %s1467_s5 = sld [smem:[#allocation8 + $0x4d]]  ;;  %s1480_s6 = sld [smem:[#allocation8 + $0x47]]  ;;  %vm222_vm2 = vcmask 261120  }
  0x35   :  { %151 = vrot.lane.b32.xlu0 %v150_v44, %s1654_s0  ;;  %v113_v47 = vsel %vm112_vm4, %v107_v42, %v111_v46  ;;  %v1258_v28 = vstv %s1547_s21  ;;  %v781_v29 = vstv %s1509_s22  ;;  %s1463_s7 = sld [smem:[#allocation8 + $0x31]]  ;;  %s1494_s8 = sld [smem:[#allocation8 + $0x48]]  ;;  %vm496_vm3 = vcmask 1039360  }
  0x36   :  { %v115_v48 = vsel %vm114_vm5, %v107_v42, %v113_v47  ;;  %v968_v32 = vstv %s1525_s23  ;;  %v1103_v33 = vstv %s1535_s24  ;;  %s1478_s9 = sld [smem:[#allocation8 + $0x39]]  ;;  %s1506_s10 = sld [smem:[#allocation8 + $0x3b]]  ;;  %vm671_vm6 = vcmask 1031168  }
  0x37   :  { %v1278_v36 = vstv %s1549_s26  ;;  %v801_v37 = vstv %s1511_s27  ;;  %s1469_s13 = sld [smem:[#allocation8 + $0x5b]]  ;;  %s1496_s14 = sld [smem:[#allocation8 + $0x56]] }
  0x38   :  { %v1298_v40 = vstv %s1551_s28  ;;  %v1123_v41 = vstv %s1537_s29  ;;  %s1492_s16 = sld [smem:[#allocation8 + $0x3a]]  ;;  %s1487_s17 = sld [smem:[#allocation8 + $0x17]] }
  0x39   :  { %116 = vrot.lane.b32.xlu0 %v115_v48, %s1654_s0  ;;  %s1539_s0 = sld [smem:[#allocation8 + $0x60]]  ;;  %v251_v46 = vstv %s1465_s30  ;;  %s1482_s18 = sld [smem:[#allocation8 + $0x55]] }
  0x3a   :  { %s1489_s19 = sld [smem:[#allocation8 + $0x25]]  ;;  %s1515_s21 = sld [smem:[#allocation8 + $0x19]] }
  0x3b   :  { %s1475_s22 = sld [smem:[#allocation8 + $0x24]]  ;;  %s1517_s23 = sld [smem:[#allocation8 + $0x27]] }
  0x3c   :  { %s1501_s24 = sld [smem:[#allocation8 + $0x18]]  ;;  %s1659_s26 = smov 96  }
  0x3d   :  { %s1531_s27 = sld [smem:[#allocation8 + $0x28]]  ;;  %s1503_s28 = sld [smem:[#allocation8 + $0x26]] }
  0x3e   :  { %s1660_s29 = smov 64   ;;  %s1529_s30 = sld [smem:[#allocation8 + $0x1a]] }
  0x3f   :  { %v1143_v44 = vstv %s1539_s0  ;;  %s1545_s0 = sld [smem:[#allocation8 + $0x29]] }
  0xa7   :  { %v152_v49 = vpop.permute.xlu0 %151 }
  0xa8   :  { %v153_v50 = vrot.slane %v152_v49, 6 }
  0xaa   :  { %v154_v51 = vsel %vm119_vm10, %v153_v50, %v152_v49  ;;  %v1318_v49 = vstv %s1553_s4  ;;  %v272_v50 = vstv %s1467_s5  ;;  %s1508_s4 = sld [smem:[#allocation8 + $0x49]]  ;;  %s1543_s5 = sld [smem:[#allocation8 + $0x1b]] }
  0xab   :  { %157 = vst.msk [vmem:[#allocation2 + $0x6] sm:$0x3f] %vm126_vm11, %v154_v51  ;;  %v117_v52 = vpop.permute.xlu0 %116 }
  0xac   :  { %v118_v53 = vrot.slane %v117_v52, 6 }
  0xae   :  { %v120_v54 = vsel %vm119_vm10, %v118_v53, %v117_v52  ;;  %v421_v53 = vstv %s1480_s6  ;;  %s1522_s6 = sld [smem:[#allocation8 + $0x4a]] }
  0xaf   :  { %127 = vst.msk [vmem:[#allocation2] sm:$0x3f] %vm126_vm11, %v120_v54  ;;  %vm840_vm11 = vcmask 1022976  }
  0xb2   :  { %v1718_v57 = vld [vmem:[#allocation2 + $0x6] sm:$0x3f] }
  0xb3   :  { %v412_v58 = vmul.f32 %v411_v55, %v1718_v57  ;;  %v392_v59 = vmul.f32 %v391_v56, %v1718_v57  ;;  %v1722_v61 = vld [vmem:[#allocation2 + $0x6] sm:$0x3f]  ;;  %v432_v63 = vmul.f32 %v431_v60, %v1718_v57  ;;  %v452_v10 = vmul.f32 %v451_v8, %v1718_v57 }
  0xb4   :  { %v567_v0 = vmul.f32 %v566_v62, %v1722_v61  ;;  %v1728_v1 = vld [vmem:[#allocation2 + $0x6] sm:$0x3f]  ;;  %v587_v6 = vmul.f32 %v586_v4, %v1722_v61  ;;  %v607_v9 = vmul.f32 %v606_v7, %v1722_v61  ;;  %v627_v20 = vmul.f32 %v626_v18, %v1722_v61 }
  0xb5   :  { %414 = vrot.lane.b32.xlu0 %v412_v58, %s1655_s11  ;;  %394 = vrot.lane.b32.xlu1 %v392_v59, %s1656_s12  ;;  %v742_v5 = vmul.f32 %v741_v3, %v1728_v1  ;;  %v1738_v13 = vld [vmem:[#allocation2 + $0x6] sm:$0x3f]  ;;  %v762_v15 = vmul.f32 %v761_v12, %v1728_v1  ;;  %v782_v31 = vmul.f32 %v781_v29, %v1728_v1  ;;  %v228_v55 = vstv %s1463_s7  ;;  %s1520_s7 = sld [smem:[#allocation8 + $0x3c]] }
  0xb6   :  { %v909_v16 = vmul.f32 %v908_v14, %v1738_v13  ;;  %v929_v19 = vmul.f32 %v928_v17, %v1738_v13  ;;  %v1748_v22 = vld [vmem:[#allocation2 + $0x6] sm:$0x3f]  ;;  %v949_v24 = vmul.f32 %v948_v21, %v1738_v13  ;;  %v969_v34 = vmul.f32 %v968_v32, %v1738_v13  ;;  %v1795_v8 = vld [vmem:[#allocation2] sm:$0x3f] }
  0xb7   :  { %v1084_v26 = vmul.f32 %v1083_v23, %v1748_v22  ;;  %v1754_v27 = vld [vmem:[#allocation2 + $0x6] sm:$0x3f]  ;;  %v1104_v35 = vmul.f32 %v1103_v33, %v1748_v22  ;;  %v802_v39 = vmul.f32 %v801_v37, %v1728_v1  ;;  %v1124_v43 = vmul.f32 %v1123_v41, %v1748_v22  ;;  %v1803_v18 = vld [vmem:[#allocation2] sm:$0x3f] }
  0xb8   :  { %v1259_v30 = vmul.f32 %v1258_v28, %v1754_v27  ;;  %v1279_v38 = vmul.f32 %v1278_v36, %v1754_v27  ;;  %v1299_v42 = vmul.f32 %v1298_v40, %v1754_v27  ;;  %v1772_v45 = vld [vmem:[#allocation2 + $0x6] sm:$0x3f]  ;;  %v1144_v47 = vmul.f32 %v1143_v44, %v1748_v22  ;;  %v1809_v21 = vld [vmem:[#allocation2] sm:$0x3f] }
  0xb9   :  { %434 = vrot.lane.b32.xlu0 %v432_v63, %s1657_s15  ;;  %569 = vrot.lane.b32.xlu1 %v567_v0, %s1656_s12  ;;  %v252_v48 = vmul.f32 %v251_v46, %v1772_v45  ;;  %v1319_v51 = vmul.f32 %v1318_v49, %v1754_v27  ;;  %v273_v52 = vmul.f32 %v272_v50, %v1772_v45  ;;  %v227_v54 = vld [vmem:[#allocation2 + $0x6] sm:$0xf]  ;;  %v596_v59 = vstv %s1494_s8  ;;  %v1815_v29 = vld [vmem:[#allocation2] sm:$0x3f]  ;;  %s1534_s8 = sld [smem:[#allocation8 + $0x3d]] }
  0xba   :  { %v422_v56 = vmul.f32 %v421_v53, %v1718_v57  ;;  %v229_v58 = vmul.f32 %v228_v55, %v227_v54  ;;  %v401_v60 = vstv %s1478_s9  ;;  %v597_v62 = vmul.f32 %v596_v59, %v1722_v61  ;;  %2345 = vst [vmem:[#allocation15_spill] sm:$0xff] %v1809_v21  ;;  %v1821_v33 = vld [vmem:[#allocation2] sm:$0x3f]  ;;  %s1459_s9 = sld [smem:[#allocation8 + $0x15]] }
  0xbb   :  { %v402_v63 = vmul.f32 %v401_v60, %v1718_v57  ;;  %v751_v0 = vstv %s1506_s10  ;;  %v293_v3 = vstv %s1469_s13  ;;  %v576_v7 = vstv %s1492_s16  ;;  %2346 = vst [vmem:[#allocation16_spill] sm:$0xff] %v1821_v33  ;;  %s1510_s10 = sld [smem:[#allocation8 + $0x57]]  ;;  %v1841_v53 = vld [vmem:[#allocation2] sm:$0x3f]  ;;  %s1474_s16 = sld [smem:[#allocation8 + $0x1d]] }
  0xbc   :  { %v752_v4 = vmul.f32 %v751_v0, %v1728_v1  ;;  %v577_v12 = vmul.f32 %v576_v7, %v1722_v61  ;;  %v441_v14 = vstv %s1482_s18  ;;  %v545_v17 = vstv %s1489_s19  ;;  %s1472_s13 = sld [smem:[#allocation8 + $0xf]]  ;;  %s1488_s18 = sld [smem:[#allocation8 + $0x1e]] }
  0xbd   :  { %744 = vrot.lane.b32.xlu0 %v742_v5, %s1656_s12  ;;  %589 = vrot.lane.b32.xlu1 %v587_v6, %s1655_s11  ;;  %v294_v5 = vmul.f32 %v293_v3, %v1772_v45  ;;  %v616_v6 = vstv %s1496_s14  ;;  %v867_v23 = vstv %s1515_s21  ;;  %s1461_s14 = sld [smem:[#allocation8 + $0x23]]  ;;  %s1500_s21 = sld [smem:[#allocation8 + $0x11]] }
  0xbe   :  { %v887_v28 = vstv %s1517_s23  ;;  %v1042_v40 = vstv %s1529_s30  ;;  %v1217_v44 = vstv %s1543_s5  ;;  %v918_v49 = vstv %s1520_s7  ;;  %s1476_s19 = sld [smem:[#allocation8 + $0x2b]]  ;;  %s1514_s23 = sld [smem:[#allocation8 + $0x12]] }
  0xbf   :  { %s1518_s30 = sld [smem:[#allocation8 + $0x2e]]  ;;  %s1542_s5 = sld [smem:[#allocation8 + $0x14]] }
  0xc0   :  { %v185_v54 = vstv %s1459_s9  ;;  %s1544_s7 = sld [smem:[#allocation8 + $0x22]]  ;;  %s1536_s9 = sld [smem:[#allocation8 + $0x4b]] }
  0xc1   :  { %609 = vrot.lane.b32.xlu0 %v607_v9, %s1657_s15  ;;  %454 = vrot.lane.b32.xlu1 %v452_v10, %s1658_s20  ;;  %v525_v9 = vstv %s1487_s17  ;;  %v617_v10 = vmul.f32 %v616_v6, %v1722_v61  ;;  %v546_v61 = vmul.f32 %v545_v17, %v1795_v8  ;;  %s1486_s17 = sld [smem:[#allocation8 + $0x10]]  ;;  %v360_v0 = vstv %s1474_s16  ;;  %s1550_s16 = sld [smem:[#allocation8 + $0x4c]] }
  0xc2   :  { %v340_v59 = vstv %s1472_s13  ;;  %v535_v6 = vstv %s1488_s18  ;;  %s1538_s13 = sld [smem:[#allocation8 + $0x59]]  ;;  %s1963_s18 = sld [smem:[#allocation8 + $0x5a]] }
  0xc3   :  { %v536_v7 = vmul.f32 %v535_v6, %v1795_v8  ;;  %v690_v17 = vstv %s1500_s21  ;;  %s1969_s21 = sld [smem:[#allocation8 + $0xa]] }
  0xc5   :  { %764 = vrot.lane.b32.xlu0 %v762_v15, %s1655_s11  ;;  %911 = vrot.lane.b32.xlu1 %v909_v16, %s1656_s12  ;;  %v526_v15 = vmul.f32 %v525_v9, %v1795_v8  ;;  %v442_v16 = vmul.f32 %v441_v14, %v1718_v57  ;;  %v868_v57 = vmul.f32 %v867_v23, %v1809_v21  ;;  %v380_v9 = vstv %s1476_s19  ;;  %s1965_s19 = sld [smem:[#allocation8 + $0x8]] }
  0xc6   :  { %v691_v23 = vmul.f32 %v690_v17, %v1815_v29 }
  0xc7   :  { %v1288_v17 = vstv %s1550_s16  ;;  %s163_s16 = sld [smem:[#allocation8]] }
  0xc9   :  { %931 = vrot.lane.b32.xlu0 %v929_v19, %s1655_s11  ;;  %629 = vrot.lane.b32.xlu1 %v627_v20, %s1658_s20 }
  0xcd   :  { %951 = vrot.lane.b32.xlu0 %v949_v24, %s1657_s15  ;;  %1086 = vrot.lane.b32.xlu1 %v1084_v26, %s1656_s12  ;;  %v370_v24 = vstv %s1475_s22  ;;  %s1502_s22 = sld [smem:[#allocation8 + $0x1f]] }
  0xce   :  { %v371_v26 = vmul.f32 %v370_v24, %v1803_v18 }
  0xd1   :  { %1261 = vrot.lane.b32.xlu0 %v1259_v30, %s1656_s12  ;;  %784 = vrot.lane.b32.xlu1 %v782_v31, %s1657_s15  ;;  %v700_v30 = vstv %s1501_s24  ;;  %v888_v31 = vmul.f32 %v887_v28, %v1809_v21  ;;  %s1516_s24 = sld [smem:[#allocation8 + $0x20]] }
  0xd2   :  { %v701_v32 = vmul.f32 %v700_v30, %v1815_v29 }
  0xd5   :  { %971 = vrot.lane.b32.xlu0 %v969_v34, %s1658_s20  ;;  %1106 = vrot.lane.b32.xlu1 %v1104_v35, %s1655_s11  ;;  %v1062_v34 = vstv %s1531_s27  ;;  %v720_v35 = vstv %s1503_s28  ;;  %s1528_s27 = sld [smem:[#allocation8 + $0x13]]  ;;  %s1504_s28 = sld [smem:[#allocation8 + $0x2d]] }
  0xd6   :  { %v1063_v36 = vmul.f32 %v1062_v34, %v1821_v33  ;;  %v721_v37 = vmul.f32 %v720_v35, %v1815_v29 }
  0xd9   :  { %1281 = vrot.lane.b32.xlu0 %v1279_v38, %s1655_s11  ;;  %804 = vrot.lane.b32.xlu1 %v802_v39, %s1658_s20  ;;  %v1827_v38 = vld [vmem:[#allocation2] sm:$0x3f]  ;;  %v1237_v39 = vstv %s1545_s0  ;;  %s1661_s0 = smov 32  }
  0xda   :  { %2347 = vst [vmem:[#allocation17_spill] sm:$0xff] %v1827_v38  ;;  %v1238_v41 = vmul.f32 %v1237_v39, %v1827_v38 }
  0xdb   :  { %v1032_v34 = vstv %s1528_s27  ;;  %v730_v35 = vstv %s1504_s28  ;;  %s2061_s27 = sld [smem:[#allocation8 + $0x2a]]  ;;  %s2086_s28 = sld [smem:[#allocation8 + $0x7]] }
  0xdc   :  { %v1033_v39 = vmul.f32 %v1032_v34, %v1821_v33 }
  0xdd   :  { %1301 = vrot.lane.b32.xlu0 %v1299_v42, %s1657_s15  ;;  %1126 = vrot.lane.b32.xlu1 %v1124_v43, %s1657_s15  ;;  %v1043_v42 = vmul.f32 %v1042_v40, %v1821_v33  ;;  %v771_v43 = vstv %s1508_s4  ;;  %s1530_s4 = sld [smem:[#allocation8 + $0x21]]  ;;  %v731_v40 = vmul.f32 %v730_v35, %v1815_v29 }
  0xde   :  { %v772_v46 = vmul.f32 %v771_v43, %v1728_v1 }
  0xe1   :  { %1146 = vrot.lane.b32.xlu1 %v1144_v47, %s1658_s20  ;;  %254 = vrot.lane.b32.xlu0 %v252_v48, %s1655_s11  ;;  %v1218_v47 = vmul.f32 %v1217_v44, %v1827_v38  ;;  %v938_v48 = vstv %s1522_s6  ;;  %s1532_s6 = sld [smem:[#allocation8 + $0x2f]] }
  0xe2   :  { %v939_v50 = vmul.f32 %v938_v48, %v1738_v13  ;;  %v1207_v48 = vstv %s1542_s5  ;;  %s2102_s5 = sld [smem:[#allocation8 + $0x1]] }
  0xe5   :  { %1321 = vrot.lane.b32.xlu1 %v1319_v51, %s1658_s20  ;;  %275 = vrot.lane.b32.xlu0 %v273_v52, %s1657_s15  ;;  %v919_v51 = vmul.f32 %v918_v49, %v1738_v13  ;;  %v1093_v52 = vstv %s1534_s8  ;;  %s1546_s8 = sld [smem:[#allocation8 + $0x30]] }
  0xe6   :  { %v1094_v55 = vmul.f32 %v1093_v52, %v1748_v22  ;;  %v1208_v52 = vmul.f32 %v1207_v48, %v1827_v38 }
  0xe7   :  { %v1072_v49 = vstv %s1532_s6  ;;  %s2104_s6 = sld [smem:[#allocation8 + $0x38]] }
  0xe9   :  { %424 = vrot.lane.b32.xlu0 %v422_v56, %s1657_s15  ;;  %231 = vrot.lane.b32.xlu1 %v229_v58, %s1656_s12  ;;  %s1473_s12 = sld [smem:[#allocation8 + $0x16]]  ;;  %v186_v56 = vmul.f32 %v185_v54, %v1841_v53  ;;  %v791_v58 = vstv %s1510_s10  ;;  %s1524_s10 = sld [smem:[#allocation8 + $0x58]]  ;;  %v1073_v54 = vmul.f32 %v1072_v49, %v1821_v33 }
  0xea   :  { %v792_v60 = vmul.f32 %v791_v58, %v1728_v1 }
  0xed   :  { %599 = vrot.lane.b32.xlu0 %v597_v62, %s1657_s15  ;;  %404 = vrot.lane.b32.xlu1 %v402_v63, %s1655_s11  ;;  %v341_v62 = vmul.f32 %v340_v59, %v1803_v18  ;;  %v206_v63 = vstv %s1461_s14  ;;  %s1548_s14 = sld [smem:[#allocation8 + $0x3e]] }
  0xee   :  { %v207_v3 = vmul.f32 %v206_v63, %v1841_v53  ;;  %v1113_v63 = vstv %s1536_s9  ;;  %s2119_s9 = sld [smem:[#allocation8 + $0x3]] }
  0xef   :  { %v350_v19 = vstv %s1473_s12  ;;  %s1490_s12 = sld [smem:[#allocation8 + $0x2c]] }
  0xf0   :  { %v351_v20 = vmul.f32 %v350_v19, %v1803_v18  ;;  %v710_v19 = vstv %s1502_s22  ;;  %s1971_s22 = sld [smem:[#allocation8 + $0xc]] }
  0xf1   :  { %754 = vrot.lane.b32.xlu0 %v752_v4, %s1655_s11  ;;  %296 = vrot.lane.b32.xlu1 %v294_v5, %s1658_s20  ;;  %v361_v4 = vmul.f32 %v360_v0, %v1803_v18  ;;  %v515_v5 = vstv %s1486_s17  ;;  %v711_v24 = vmul.f32 %v710_v19, %v1815_v29  ;;  %v958_v0 = vstv %s1524_s10  ;;  %s1485_s17 = sld [smem:[#allocation8 + $0x9]]  ;;  %s1665_s10 = smov 124  }
  0xf2   :  { %v516_v1 = vmul.f32 %v515_v5, %v1795_v8  ;;  %v1114_v5 = vmul.f32 %v1113_v63, %v1748_v22  ;;  %v959_v6 = vmul.f32 %v958_v0, %v1738_v13  ;;  %v686_v63 = vstv %s1969_s21 }
  0xf5   :  { %619 = vrot.lane.b32.xlu0 %v617_v10, %s1658_s20  ;;  %579 = vrot.lane.b32.xlu1 %v577_v12, %s1655_s11  ;;  %v555_v10 = vstv %s1490_s12  ;;  %s1967_s12 = sld [smem:[#allocation8 + $0xb]] }
  0xf6   :  { %v1028_v0 = vstv %s1971_s22 }
  0xf9   :  { %444 = vrot.lane.b32.xlu1 %v442_v16, %s1658_s20  ;;  %528 = vrot.lane.b32.xlu0 %v526_v15, %s1659_s26  ;;  %v381_v15 = vmul.f32 %v380_v9, %v1803_v18  ;;  %v556_v16 = vmul.f32 %v555_v10, %v1795_v8 }
  0xfd   :  { %548 = vrot.lane.b32.xlu0 %v546_v61, %s1660_s29  ;;  %353 = vrot.lane.b32.xlu1 %v351_v20, %s1659_s26 }
 0x101   :  { %870 = vrot.lane.b32.xlu0 %v868_v57, %s1659_s26  ;;  %373 = vrot.lane.b32.xlu1 %v371_v26, %s1660_s29  ;;  %v857_v57 = vstv %s1514_s23  ;;  %v877_v26 = vstv %s1516_s24  ;;  %s1977_s23 = sld [smem:[#allocation8 + $0xd]]  ;;  %s2035_s24 = sld [smem:[#allocation8 + $0xe]] }
 0x105   :  { %890 = vrot.lane.b32.xlu0 %v888_v31, %s1660_s29  ;;  %703 = vrot.lane.b32.xlu1 %v701_v32, %s1659_s26  ;;  %v858_v31 = vmul.f32 %v857_v57, %v1809_v21  ;;  %v878_v32 = vmul.f32 %v877_v26, %v1809_v21 }
 0x109   :  { %1065 = vrot.lane.b32.xlu0 %v1063_v36, %s1660_s29  ;;  %723 = vrot.lane.b32.xlu1 %v721_v37, %s1660_s29 }
 0x10d   :  { %1240 = vrot.lane.b32.xlu0 %v1238_v41, %s1660_s29  ;;  %1045 = vrot.lane.b32.xlu1 %v1043_v42, %s1659_s26  ;;  %v897_v41 = vstv %s1518_s30  ;;  %v1052_v42 = vstv %s1530_s4  ;;  %s2088_s30 = sld [smem:[#allocation8 + $0x46]]  ;;  %s2097_s4 = sld [smem:[#allocation8 + $0x1c]] }
 0x111   :  { %774 = vrot.lane.b32.xlu0 %v772_v46, %s1657_s15  ;;  %1220 = vrot.lane.b32.xlu1 %v1218_v47, %s1659_s26  ;;  %v898_v46 = vmul.f32 %v897_v41, %v1809_v21  ;;  %v1053_v47 = vmul.f32 %v1052_v42, %v1821_v33 }
 0x115   :  { %941 = vrot.lane.b32.xlu0 %v939_v50, %s1657_s15  ;;  %921 = vrot.lane.b32.xlu1 %v919_v51, %s1655_s11 }
 0x119   :  { %1096 = vrot.lane.b32.xlu1 %v1094_v55, %s1655_s11  ;;  %188 = vrot.lane.b32.xlu0 %v186_v56, %s1659_s26  ;;  %v1227_v55 = vstv %s1544_s7  ;;  %v1247_v56 = vstv %s1546_s8  ;;  %s2112_s7 = sld [smem:[#allocation8 + $0x2]]  ;;  %s2115_s8 = sld [smem:[#allocation8 + $0x54]] }
 0x11d   :  { %794 = vrot.lane.b32.xlu1 %v792_v60, %s1658_s20  ;;  %343 = vrot.lane.b32.xlu0 %v341_v62, %s1659_s26  ;;  %v1228_v60 = vmul.f32 %v1227_v55, %v1827_v38  ;;  %v1248_v62 = vmul.f32 %v1247_v56, %v1827_v38  ;;  %v336_v55 = vstv %s1965_s19 }
 0x121   :  { %209 = vrot.lane.b32.xlu1 %v207_v3, %s1660_s29  ;;  %363 = vrot.lane.b32.xlu0 %v361_v4, %s1660_s29 }
 0x125   :  { %518 = vrot.lane.b32.xlu1 %v516_v1, %s1659_s26  ;;  %538 = vrot.lane.b32.xlu0 %v536_v7, %s1660_s29  ;;  %v1133_v1 = vstv %s1538_s13  ;;  %v1268_v7 = vstv %s1548_s14  ;;  %s1666_s13 = smov 123   ;;  %s1667_s14 = smov 122  }
 0x127   :  { %v1861_v12 = vpop.permute.xlu0 %414  ;;  %v1863_v14 = vpop.permute.xlu1 %394 }
 0x128   :  { %v396_v11 = vrot.slane %v1863_v14, 6 }
 0x129   :  { %383 = vrot.lane.b32.xlu1 %v381_v15, %s1661_s0  ;;  %558 = vrot.lane.b32.xlu0 %v556_v16, %s1661_s0  ;;  %v1134_v15 = vmul.f32 %v1133_v1, %v1748_v22  ;;  %v1269_v16 = vmul.f32 %v1268_v7, %v1754_v27  ;;  %v1203_v7 = vstv %s1977_s23 }
 0x12b   :  { %v1869_v61 = vpop.permute.xlu0 %434  ;;  %v1871_v20 = vpop.permute.xlu1 %569 }
 0x12d   :  { %693 = vrot.lane.b32.xlu1 %v691_v23, %s1659_s26  ;;  %713 = vrot.lane.b32.xlu0 %v711_v24, %s1660_s29  ;;  %v1289_v23 = vmul.f32 %v1288_v17, %v1754_v27  ;;  %v416_v17 = vrot.slane %v1861_v12, 2 }
 0x12f   :  { %v1877_v28 = vpop.permute.xlu0 %744  ;;  %v1879_v30 = vpop.permute.xlu1 %589 }
 0x131   :  { %860 = vrot.lane.b32.xlu1 %v858_v31, %s1659_s26  ;;  %880 = vrot.lane.b32.xlu0 %v878_v32, %s1660_s29 }
 0x133   :  { %v1885_v36 = vpop.permute.xlu0 %609  ;;  %v1887_v37 = vpop.permute.xlu1 %454 }
 0x135   :  { %1035 = vrot.lane.b32.xlu1 %v1033_v39, %s1659_s26  ;;  %733 = vrot.lane.b32.xlu0 %v731_v40, %s1661_s0 }
 0x137   :  { %v1893_v43 = vpop.permute.xlu0 %764  ;;  %v1895_v44 = vpop.permute.xlu1 %911 }
 0x139   :  { %900 = vrot.lane.b32.xlu1 %v898_v46, %s1661_s0  ;;  %1055 = vrot.lane.b32.xlu0 %v1053_v47, %s1660_s29 }
 0x13b   :  { %v1901_v50 = vpop.permute.xlu0 %931  ;;  %v1903_v51 = vpop.permute.xlu1 %629 }
 0x13d   :  { %1210 = vrot.lane.b32.xlu1 %v1208_v52, %s1659_s26  ;;  %1075 = vrot.lane.b32.xlu0 %v1073_v54, %s1661_s0  ;;  %v511_v52 = vstv %s1485_s17 }
 0x13f   :  { %v1909_v58 = vpop.permute.xlu0 %951  ;;  %v1911_v59 = vpop.permute.xlu1 %1086 }
 0x141   :  { %1230 = vrot.lane.b32.xlu1 %v1228_v60, %s1660_s29  ;;  %1250 = vrot.lane.b32.xlu0 %v1248_v62, %s1661_s0  ;;  %v853_v62 = vstv %s1967_s12 }
 0x142   :  { %v854_v56 = vmul.f32 %v853_v62, %v1809_v21  ;;  %v417_v62 = vsel %vm246_vm13, %v1861_v12, %v416_v17 }
 0x143   :  { %v1917_v3 = vpop.permute.xlu0 %1261  ;;  %v1919_v4 = vpop.permute.xlu1 %784 }
 0x145   :  { %1116 = vrot.lane.b32.xlu1 %v1114_v5, %s1657_s15  ;;  %961 = vrot.lane.b32.xlu0 %v959_v6, %s1658_s20  ;;  %v512_v5 = vmul.f32 %v511_v52, %v1795_v8 }
 0x147   :  { %v1925_v9 = vpop.permute.xlu0 %971  ;;  %v1927_v10 = vpop.permute.xlu1 %1106 }
 0x149   :  { %1136 = vrot.lane.b32.xlu1 %v1134_v15, %s1658_s20  ;;  %1271 = vrot.lane.b32.xlu0 %v1269_v16, %s1655_s11 }
 0x14b   :  { %v1933_v13 = vpop.permute.xlu0 %1281  ;;  %v1935_v19 = vpop.permute.xlu1 %804 }
 0x14d   :  { %1291 = vrot.lane.b32.xlu0 %v1289_v23, %s1657_s15 }
 0x14f   :  { %v1939_v24 = vpop.permute.xlu0 %1301  ;;  %v1941_v57 = vpop.permute.xlu1 %1126 }
 0x153   :  { %v1943_v22 = vpop.permute.xlu1 %1146  ;;  %v1945_v26 = vpop.permute.xlu0 %254 }
 0x157   :  { %v1947_v31 = vpop.permute.xlu1 %1321  ;;  %v1949_v32 = vpop.permute.xlu0 %275 }
 0x15b   :  { %v1951_v34 = vpop.permute.xlu0 %424  ;;  %v1953_v35 = vpop.permute.xlu1 %231 }
 0x15f   :  { %v1955_v39 = vpop.permute.xlu0 %599  ;;  %v1957_v40 = vpop.permute.xlu1 %404 }
 0x160   :  { %2348 = vst [vmem:[#allocation18_spill] sm:$0xff] %v1955_v39  ;;  %v1998_v39 = vmul.f32 %v1028_v0, %v1821_v33  ;;  %v611_v0 = vrot.slane %v1885_v36, 2 }
 0x163   :  { %v1959_v41 = vpop.permute.xlu0 %754  ;;  %v1961_v42 = vpop.permute.xlu1 %296 }
 0x164   :  { %2349 = vst [vmem:[#allocation19_spill] sm:$0xff] %v1959_v41 }
 0x167   :  { %v1973_v46 = vpop.permute.xlu0 %619  ;;  %v1975_v47 = vpop.permute.xlu1 %579 }
 0x168   :  { %2350 = vst [vmem:[#allocation20_spill] sm:$0xff] %v1973_v46  ;;  %v687_v46 = vmul.f32 %v686_v63, %v1815_v29 }
 0x16b   :  { %v1979_v48 = vpop.permute.xlu1 %444  ;;  %v529_v49 = vpop.permute.xlu0 %528 }
 0x16c   :  { %2351 = vst [vmem:[#allocation21_spill] sm:$0xff] %v1979_v48  ;;  %v530_v54 = vrot.slane %v529_v49, 2 }
 0x16e   :  { %v531_v60 = vsel %vm180_vm12, %v529_v49, %v530_v54  ;;  %v337_v49 = vmul.f32 %v336_v55, %v1803_v18  ;;  %v571_v54 = vrot.slane %v1871_v20, 6  ;;  %v436_v55 = vrot.slane %v1869_v61, 2 }
 0x16f   :  { %v549_v6 = vpop.permute.xlu0 %548  ;;  %v354_v1 = vpop.permute.xlu1 %353  ;;  %v533_v23 = vadd.f32 %v531_v60, %v512_v5 }
 0x170   :  { %v550_v15 = vrot.slane %v549_v6, 2  ;;  %v355_v16 = vrot.slane %v354_v1, 2  ;;  %v572_v63 = vsel %vm234_vm15, %v571_v54, %v1871_v20  ;;  %v913_v20 = vrot.slane %v1895_v44, 6 }
 0x172   :  { %v551_v2 = vsel %vm201_vm14, %v549_v6, %v550_v15  ;;  %v356_v52 = vsel %vm180_vm12, %v354_v1, %v355_v16  ;;  %v2002_v6 = vmul.f32 %v1203_v7, %v1827_v38  ;;  %v746_v1 = vrot.slane %v1877_v28, 6 }
 0x173   :  { %v553_v25 = vadd.f32 %v551_v2, %v533_v23  ;;  %v871_v41 = vpop.permute.xlu0 %870  ;;  %v374_v48 = vpop.permute.xlu1 %373  ;;  %v591_v2 = vrot.slane %v1879_v30, 2  ;;  %v358_v15 = vadd.f32 %v356_v52, %v337_v49  ;;  %v397_v7 = vsel %vm234_vm15, %v396_v11, %v1863_v14 }
 0x174   :  { %v872_v60 = vrot.slane %v871_v41, 2  ;;  %v375_v5 = vrot.slane %v374_v48, 2  ;;  %v456_v38 = vrot.slane %v1887_v37, 2  ;;  %v437_v49 = vsel %vm267_vm0, %v1869_v61, %v436_v55 }
 0x175   :  { %v574_v12 = vadd.f32 %v572_v63, %v553_v25  ;;  %v612_v25 = vsel %vm267_vm0, %v1885_v36, %v611_v0  ;;  %v953_v36 = vrot.slane %v1909_v58, 2 }
 0x176   :  { %v873_v16 = vsel %vm180_vm12, %v871_v41, %v872_v60  ;;  %v376_v23 = vsel %vm201_vm14, %v374_v48, %v375_v5  ;;  %v747_v41 = vsel %vm234_vm15, %v746_v1, %v1877_v28  ;;  %v592_v48 = vsel %vm246_vm13, %v1879_v30, %v591_v2 }
 0x177   :  { %v378_v17 = vadd.f32 %v376_v23, %v358_v15  ;;  %v891_v33 = vpop.permute.xlu0 %890  ;;  %v704_v21 = vpop.permute.xlu1 %703  ;;  %v875_v11 = vadd.f32 %v873_v16, %v854_v56  ;;  %v933_v60 = vrot.slane %v1901_v50, 2  ;;  %v457_v55 = vsel %vm288_vm1, %v1887_v37, %v456_v38 }
 0x178   :  { %v892_v54 = vrot.slane %v891_v33, 2  ;;  %v705_v52 = vrot.slane %v704_v21, 2  ;;  %v594_v15 = vadd.f32 %v592_v48, %v574_v12  ;;  %v766_v30 = vrot.slane %v1893_v43, 2 }
 0x179   :  { %v399_v14 = vadd.f32 %v397_v7, %v378_v17  ;;  %v914_v56 = vsel %vm234_vm15, %v913_v20, %v1895_v44  ;;  %v934_v38 = vsel %vm246_vm13, %v1901_v50, %v933_v60  ;;  %v786_v37 = vrot.slane %v1919_v4, 2 }
 0x17a   :  { %v893_v5 = vsel %vm201_vm14, %v891_v33, %v892_v54  ;;  %v706_v61 = vsel %vm180_vm12, %v704_v21, %v705_v52  ;;  %v631_v33 = vrot.slane %v1903_v51, 2  ;;  %v614_v52 = vadd.f32 %v612_v25, %v594_v15 }
 0x17b   :  { %v419_v63 = vadd.f32 %v417_v62, %v399_v14  ;;  %v895_v28 = vadd.f32 %v893_v5, %v875_v11  ;;  %v1066_v1 = vpop.permute.xlu0 %1065  ;;  %v724_v23 = vpop.permute.xlu1 %723  ;;  %v708_v21 = vadd.f32 %v706_v61, %v687_v46  ;;  %v973_v62 = vrot.slane %v1925_v9, 2 }
 0x17c   :  { %v725_v2 = vrot.slane %v724_v23, 2  ;;  %v767_v46 = vsel %vm246_vm13, %v1893_v43, %v766_v30  ;;  %v1067_v48 = vrot.slane %v1066_v1, 2  ;;  %v632_v11 = vsel %vm288_vm1, %v1903_v51, %v631_v33 }
 0x17d   :  { %v916_v0 = vadd.f32 %v914_v56, %v895_v28  ;;  %v439_v16 = vadd.f32 %v437_v49, %v419_v63  ;;  %v954_v49 = vsel %vm267_vm0, %v1909_v58, %v953_v36  ;;  %v1088_v14 = vrot.slane %v1911_v59, 6 }
 0x17e   :  { %v726_v7 = vsel %vm201_vm14, %v724_v23, %v725_v2  ;;  %v787_v25 = vsel %vm267_vm0, %v1919_v4, %v786_v37  ;;  %v974_v43 = vsel %vm288_vm1, %v1925_v9, %v973_v62  ;;  %v806_v61 = vrot.slane %v1935_v19, 2 }
 0x17f   :  { %v936_v44 = vadd.f32 %v934_v38, %v916_v0  ;;  %v728_v12 = vadd.f32 %v726_v7, %v708_v21  ;;  %v1241_v17 = vpop.permute.xlu0 %1240  ;;  %v1046_v20 = vpop.permute.xlu1 %1045  ;;  %v459_v54 = vadd.f32 %v457_v55, %v439_v16  ;;  %v634_v63 = vadd.f32 %v632_v11, %v614_v52 }
 0x180   :  { %v1047_v50 = vrot.slane %v1046_v20, 2  ;;  %v1108_v23 = vrot.slane %v1927_v10, 2  ;;  %v1068_v4 = vsel %vm201_vm14, %v1066_v1, %v1067_v48  ;;  %v1242_v30 = vrot.slane %v1241_v17, 2 }
 0x181   :  { %v749_v60 = vadd.f32 %v747_v41, %v728_v12  ;;  %461 = vrot.lane.b32.xlu1 %v459_v54, %s1655_s11  ;;  %v956_v5 = vadd.f32 %v954_v49, %v936_v44  ;;  %v1089_v9 = vsel %vm234_vm15, %v1088_v14, %v1911_v59  ;;  %v174_v2 = vstv %s2035_s24 }
 0x182   :  { %v1048_v58 = vsel %vm180_vm12, %v1046_v20, %v1047_v50  ;;  %v1263_v33 = vrot.slane %v1917_v3, 6  ;;  %v807_v1 = vsel %vm288_vm1, %v1935_v19, %v806_v61  ;;  %v1128_v0 = vrot.slane %v1941_v57, 2 }
 0x183   :  { %v769_v55 = vadd.f32 %v767_v46, %v749_v60  ;;  %v1050_v51 = vadd.f32 %v1048_v58, %v1998_v39  ;;  %v2057_v15 = vpop.permute.xlu0 %774  ;;  %v1221_v41 = vpop.permute.xlu1 %1220  ;;  %v976_v28 = vadd.f32 %v974_v43, %v956_v5  ;;  %v2352_v7 = vstv %s1963_s18 }
 0x184   :  { %v1222_v56 = vrot.slane %v1221_v41, 2  ;;  %v1309_v44 = vmul.f32 %v2352_v7, %v1754_v27  ;;  %v1109_v12 = vsel %vm246_vm13, %v1927_v10, %v1108_v23  ;;  %v1283_v19 = vrot.slane %v1933_v13, 2 }
 0x185   :  { %v1070_v36 = vadd.f32 %v1068_v4, %v1050_v51  ;;  %636 = vrot.lane.b32.xlu1 %v634_v63, %s1655_s11  ;;  %978 = vrot.lane.b32.xlu0 %v976_v28, %s1655_s11  ;;  %v789_v39 = vadd.f32 %v787_v25, %v769_v55  ;;  %v1148_v20 = vrot.slane %v1943_v22, 2  ;;  %v1243_v54 = vsel %vm201_vm14, %v1241_v17, %v1242_v30 }
 0x186   :  { %v1223_v21 = vsel %vm180_vm12, %v1221_v41, %v1222_v56  ;;  %v1264_v10 = vsel %vm234_vm15, %v1263_v33, %v1917_v3  ;;  %v1303_v52 = vrot.slane %v1939_v24, 2  ;;  %v1129_v46 = vsel %vm267_vm0, %v1941_v57, %v1128_v0 }
 0x187   :  { %v1091_v16 = vadd.f32 %v1089_v9, %v1070_v36  ;;  %v1225_v38 = vadd.f32 %v1223_v21, %v2002_v6  ;;  %v2074_v59 = vpop.permute.xlu0 %941  ;;  %v2076_v37 = vpop.permute.xlu1 %921  ;;  %v809_v62 = vadd.f32 %v807_v1, %v789_v39  ;;  %v175_v50 = vmul.f32 %v174_v2, %v1841_v53 }
 0x188   :  { %v1284_v3 = vsel %vm246_vm13, %v1933_v13, %v1283_v19  ;;  %v1149_v14 = vsel %vm288_vm1, %v1943_v22, %v1148_v20  ;;  %v1323_v57 = vrot.slane %v1947_v31, 2  ;;  %v216_v60 = vstv %s2061_s27 }
 0x189   :  { %v1245_v6 = vadd.f32 %v1243_v54, %v1225_v38  ;;  %811 = vrot.lane.b32.xlu1 %v809_v62, %s1655_s11  ;;  %1311 = vrot.lane.b32.xlu0 %v1309_v44, %s1658_s20  ;;  %v1111_v27 = vadd.f32 %v1109_v12, %v1091_v16  ;;  %v1304_v13 = vsel %vm267_vm0, %v1939_v24, %v1303_v52  ;;  %v170_v41 = vstv %s2086_s28 }
 0x18a   :  { %v217_v58 = vmul.f32 %v216_v60, %v1841_v53  ;;  %v1324_v51 = vsel %vm288_vm1, %v1947_v31, %v1323_v57  ;;  %v261_v63 = vstv %s2088_s30  ;;  %v195_v23 = vstv %s2097_s4 }
 0x18b   :  { %v1266_v17 = vadd.f32 %v1264_v10, %v1245_v6  ;;  %v2099_v49 = vpop.permute.xlu1 %1096  ;;  %v189_v48 = vpop.permute.xlu0 %188  ;;  %v1131_v11 = vadd.f32 %v1129_v46, %v1111_v27  ;;  %v171_v4 = vmul.f32 %v170_v41, %v1841_v53  ;;  %v332_v30 = vstv %s2102_s5  ;;  %v2353_v41 = vld [vmem:[#allocation18_spill] sm:$0xff] }
 0x18c   :  { %v190_v43 = vrot.slane %v189_v48, 2  ;;  %v262_v31 = vmul.f32 %v261_v63, %v1772_v45  ;;  %v240_v36 = vstv %s2104_s6  ;;  %v233_v39 = vrot.slane %v1953_v35, 6 }
 0x18d   :  { %177 = vrot.lane.b32.xlu0 %v175_v50, %s1659_s26  ;;  %v1151_v5 = vadd.f32 %v1149_v14, %v1131_v11  ;;  %v1286_v25 = vadd.f32 %v1284_v3, %v1266_v17  ;;  %v507_v1 = vstv %s2112_s7  ;;  %v256_v0 = vrot.slane %v1945_v26, 2  ;;  %s1662_s26 = smov 127  }
 0x18e   :  { %v191_v28 = vsel %vm180_vm12, %v189_v48, %v190_v43  ;;  %v196_v16 = vmul.f32 %v195_v23, %v1841_v53  ;;  %v282_v38 = vstv %s2115_s8  ;;  %v277_v62 = vrot.slane %v1949_v32, 2 }
 0x18f   :  { %v2121_v22 = vpop.permute.xlu1 %794  ;;  %1153 = vrot.lane.b32.xlu1 %v1151_v5, %s1655_s11  ;;  %v344_v61 = vpop.permute.xlu0 %343  ;;  %v1306_v55 = vadd.f32 %v1304_v13, %v1286_v25  ;;  %v193_v21 = vadd.f32 %v191_v28, %v171_v4  ;;  %v682_v12 = vstv %s2119_s9  ;;  %v333_v19 = vmul.f32 %v332_v30, %v1803_v18 }
 0x190   :  { %v345_v2 = vrot.slane %v344_v61, 2  ;;  %v508_v54 = vmul.f32 %v507_v1, %v1795_v8  ;;  %v241_v10 = vmul.f32 %v240_v36, %v1772_v45  ;;  %v235_v53 = vsel %vm234_vm15, %v233_v39, %v1953_v35  ;;  %v2354_v39 = vld [vmem:[#allocation20_spill] sm:$0xff] }
 0x191   :  { %219 = vrot.lane.b32.xlu0 %v217_v58, %s1661_s0  ;;  %v1326_v24 = vadd.f32 %v1324_v51, %v1306_v55  ;;  %v257_v48 = vsel %vm246_vm13, %v1945_v26, %v256_v0  ;;  %v283_v8 = vmul.f32 %v282_v38, %v1772_v45  ;;  %v278_v50 = vsel %vm267_vm0, %v1949_v32, %v277_v62  ;;  %s1664_s0 = smov 125  }
 0x192   :  { %v346_v52 = vsel %vm180_vm12, %v344_v61, %v345_v2  ;;  %v298_v11 = vrot.slane %v1961_v42, 2  ;;  %v406_v14 = vrot.slane %v1957_v40, 2  ;;  %v581_v45 = vrot.slane %v1975_v47, 2 }
 0x193   :  { %1328 = vrot.lane.b32.xlu1 %v1326_v24, %s1655_s11  ;;  %v210_v56 = vpop.permute.xlu1 %209  ;;  %v364_v9 = vpop.permute.xlu0 %363  ;;  %v348_v57 = vadd.f32 %v346_v52, %v333_v19  ;;  %v426_v61 = vrot.slane %v1951_v34, 2  ;;  %v601_v63 = vrot.slane %v2353_v41, 2  ;;  %v621_v2 = vrot.slane %v2354_v39, 2 }
 0x194   :  { %v211_v33 = vrot.slane %v210_v56, 2  ;;  %v365_v44 = vrot.slane %v364_v9, 2  ;;  %v299_v24 = vsel %vm288_vm1, %v1961_v42, %v298_v11  ;;  %v407_v4 = vsel %vm246_vm13, %v1957_v40, %v406_v14 }
 0x195   :  { %264 = vrot.lane.b32.xlu0 %v262_v31, %s1657_s15  ;;  %s2163_s15 = sld [smem:[#allocation8 + $0x4]]  ;;  %v582_v42 = vsel %vm246_vm13, %v1975_v47, %v581_v45  ;;  %v427_v40 = vsel %vm267_vm0, %v1951_v34, %v426_v61  ;;  %v602_v38 = vsel %vm267_vm0, %v2353_v41, %v601_v63  ;;  %vm1363_vm15 = vcmask 998400  }
 0x196   :  { %v212_v7 = vsel %vm201_vm14, %v210_v56, %v211_v33  ;;  %v366_v3 = vsel %vm201_vm14, %v364_v9, %v365_v44  ;;  %v2355_v33 = vld [vmem:[#allocation21_spill] sm:$0xff] }
 0x197   :  { %v214_v20 = vadd.f32 %v212_v7, %v193_v21  ;;  %v519_v6 = vpop.permute.xlu1 %518  ;;  %198 = vrot.lane.b32.xlu1 %v196_v16, %s1660_s29  ;;  %v539_v27 = vpop.permute.xlu0 %538  ;;  %v368_v58 = vadd.f32 %v366_v3, %v348_v57  ;;  %v446_v1 = vrot.slane %v2355_v33, 2  ;;  %v683_v7 = vmul.f32 %v682_v12, %v1815_v29  ;;  %v2356_v12 = vld [vmem:[#allocation19_spill] sm:$0xff]  ;;  %s1663_s29 = smov 126  }
 0x198   :  { %v520_v46 = vrot.slane %v519_v6, 2  ;;  %v540_v17 = vrot.slane %v539_v27, 2 }
 0x199   :  { %v237_v18 = vadd.f32 %v235_v53, %v214_v20  ;;  %v447_v34 = vsel %vm288_vm1, %v2355_v33, %v446_v1  ;;  %v1098_v1 = vrot.slane %v2099_v49, 2 }
 0x19a   :  { %v521_v35 = vsel %vm180_vm12, %v519_v6, %v520_v46  ;;  %v541_v32 = vsel %vm201_vm14, %v539_v27, %v540_v17  ;;  %v622_v6 = vsel %vm288_vm1, %v2354_v39, %v621_v2  ;;  %v756_v17 = vrot.slane %v2356_v12, 2 }
 0x19b   :  { %v259_v60 = vadd.f32 %v257_v48, %v237_v18  ;;  %v523_v5 = vadd.f32 %v521_v35, %v508_v54  ;;  %v384_v25 = vpop.permute.xlu1 %383  ;;  %243 = vrot.lane.b32.xlu1 %v241_v10, %s1655_s11  ;;  %v559_v26 = vpop.permute.xlu0 %558  ;;  %v849_v47 = vstv %s2163_s15  ;;  %v2357_v48 = vld [vmem:[#allocation15_spill] sm:$0xff] }
 0x19c   :  { %v385_v13 = vrot.slane %v384_v25, 2  ;;  %v560_v43 = vrot.slane %v559_v26, 2  ;;  %v850_v18 = vmul.f32 %v849_v47, %v2357_v48  ;;  %v757_v45 = vsel %vm246_vm13, %v2356_v12, %v756_v17 }
 0x19d   :  { %v543_v55 = vadd.f32 %v541_v32, %v523_v5  ;;  %v280_v51 = vadd.f32 %v278_v50, %v259_v60  ;;  %v776_v5 = vrot.slane %v2057_v15, 2  ;;  %v923_v32 = vrot.slane %v2076_v37, 2 }
 0x19e   :  { %v386_v28 = vsel %vm222_vm2, %v384_v25, %v385_v13  ;;  %v561_v23 = vsel %vm222_vm2, %v559_v26, %v560_v43  ;;  %v796_v13 = vrot.slane %v2121_v22, 2 }
 0x19f   :  { %v388_v30 = vadd.f32 %v386_v28, %v368_v58  ;;  %v563_v56 = vadd.f32 %v561_v23, %v543_v55  ;;  %v694_v9 = vpop.permute.xlu1 %693  ;;  %285 = vrot.lane.b32.xlu1 %v283_v8, %s1658_s20  ;;  %v714_v31 = vpop.permute.xlu0 %713  ;;  %v301_v36 = vadd.f32 %v299_v24, %v280_v51  ;;  %s2186_s20 = sld [smem:[#allocation8 + $0x5]]  ;;  %v2358_v28 = vld [vmem:[#allocation16_spill] sm:$0xff]  ;;  %v924_v33 = vsel %vm246_vm13, %v2076_v37, %v923_v32 }
 0x1a0   :  { %v695_v0 = vrot.slane %v694_v9, 2  ;;  %v715_v27 = vrot.slane %v714_v31, 2 }
 0x1a1   :  { %v409_v21 = vadd.f32 %v407_v4, %v388_v30  ;;  %v584_v16 = vadd.f32 %v582_v42, %v563_v56  ;;  %303 = vrot.lane.b32.xlu0 %v301_v36, %s1655_s11  ;;  %v777_v30 = vsel %vm267_vm0, %v2057_v15, %v776_v5  ;;  %v943_v56 = vrot.slane %v2074_v59, 2  ;;  %s1540_s11 = sld [smem:[#allocation8 + $0x6]]  ;;  %v2360_v5 = vld [vmem:[#allocation14_spill] sm:$0xff] }
 0x1a2   :  { %v696_v62 = vsel %vm180_vm12, %v694_v9, %v695_v0  ;;  %v716_v11 = vsel %vm201_vm14, %v714_v31, %v715_v27  ;;  %v797_v0 = vsel %vm288_vm1, %v2121_v22, %v796_v13 }
 0x1a3   :  { %v861_v44 = vpop.permute.xlu1 %860  ;;  %v881_v19 = vpop.permute.xlu0 %880  ;;  %v429_v20 = vadd.f32 %v427_v40, %v409_v21  ;;  %v604_v54 = vadd.f32 %v602_v38, %v584_v16  ;;  %v698_v53 = vadd.f32 %v696_v62, %v683_v7  ;;  %v944_v38 = vsel %vm267_vm0, %v2074_v59, %v943_v56 }
 0x1a4   :  { %v862_v10 = vrot.slane %v861_v44, 2  ;;  %v882_v3 = vrot.slane %v881_v19, 2 }
 0x1a5   :  { %v2194_v52 = vadd.f32 %v447_v34, %v429_v20  ;;  %v2196_v46 = vadd.f32 %v622_v6, %v604_v54  ;;  %v718_v57 = vadd.f32 %v716_v11, %v698_v53  ;;  %v1024_v25 = vstv %s2186_s20 }
 0x1a6   :  { %v863_v29 = vsel %vm180_vm12, %v861_v44, %v862_v10  ;;  %v883_v55 = vsel %vm201_vm14, %v881_v19, %v882_v3  ;;  %v1025_v23 = vmul.f32 %v1024_v25, %v2358_v28  ;;  %v1099_v44 = vsel %vm246_vm13, %v2099_v49, %v1098_v1 }
 0x1a7   :  { %v1036_v8 = vpop.permute.xlu1 %1035  ;;  %v734_v50 = vpop.permute.xlu0 %733  ;;  %v865_v60 = vadd.f32 %v863_v29, %v850_v18  ;;  %v1199_v17 = vstv %s1540_s11 }
 0x1a8   :  { %v1037_v35 = vrot.slane %v1036_v8, 2  ;;  %v735_v14 = vrot.slane %v734_v50, 2 }
 0x1a9   :  { %v885_v24 = vadd.f32 %v883_v55, %v865_v60 }
 0x1aa   :  { %v736_v26 = vsel %vm222_vm2, %v734_v50, %v735_v14  ;;  %v1038_v51 = vsel %vm180_vm12, %v1036_v8, %v1037_v35 }
 0x1ab   :  { %v738_v43 = vadd.f32 %v736_v26, %v718_v57  ;;  %v901_v61 = vpop.permute.xlu1 %900  ;;  %v1056_v58 = vpop.permute.xlu0 %1055  ;;  %v1040_v36 = vadd.f32 %v1038_v51, %v1025_v23  ;;  %v2359_v57 = vld [vmem:[#allocation17_spill] sm:$0xff] }
 0x1ac   :  { %v902_v41 = vrot.slane %v901_v61, 2  ;;  %v1057_v63 = vrot.slane %v1056_v58, 2  ;;  %v1200_v60 = vmul.f32 %v1199_v17, %v2359_v57 }
 0x1ad   :  { %v759_v4 = vadd.f32 %v757_v45, %v738_v43 }
 0x1ae   :  { %v903_v9 = vsel %vm222_vm2, %v901_v61, %v902_v41  ;;  %v1058_v31 = vsel %vm201_vm14, %v1056_v58, %v1057_v63 }
 0x1af   :  { %v905_v39 = vadd.f32 %v903_v9, %v885_v24  ;;  %v1076_v2 = vpop.permute.xlu0 %1075  ;;  %v779_v42 = vadd.f32 %v777_v30, %v759_v4  ;;  %v1060_v16 = vadd.f32 %v1058_v31, %v1040_v36  ;;  %v1211_v19 = vpop.permute.xlu1 %1210 }
 0x1b0   :  { %v1077_v21 = vrot.slane %v1076_v2, 2  ;;  %v1212_v29 = vrot.slane %v1211_v19, 2 }
 0x1b1   :  { %v926_v15 = vadd.f32 %v924_v33, %v905_v39  ;;  %v799_v40 = vadd.f32 %v797_v0, %v779_v42 }
 0x1b2   :  { %v1078_v62 = vsel %vm222_vm2, %v1076_v2, %v1077_v21  ;;  %v1213_v11 = vsel %vm180_vm12, %v1211_v19, %v1212_v29 }
 0x1b3   :  { %v1080_v7 = vadd.f32 %v1078_v62, %v1060_v16  ;;  %v946_v47 = vadd.f32 %v944_v38, %v926_v15  ;;  %v1251_v20 = vpop.permute.xlu0 %1250  ;;  %v1231_v54 = vpop.permute.xlu1 %1230  ;;  %v1215_v13 = vadd.f32 %v1213_v11, %v1200_v60 }
 0x1b4   :  { %v1232_v48 = vrot.slane %v1231_v54, 2  ;;  %v1252_v55 = vrot.slane %v1251_v20, 2 }
 0x1b5   :  { %v1101_v37 = vadd.f32 %v1099_v44, %v1080_v7 }
 0x1b6   :  { %v1233_v26 = vsel %vm201_vm14, %v1231_v54, %v1232_v48  ;;  %v1253_v31 = vsel %vm222_vm2, %v1251_v20, %v1252_v55 }
 0x1b7   :  { %v962_v6 = vpop.permute.xlu0 %961  ;;  %v1117_v22 = vpop.permute.xlu1 %1116  ;;  %v1235_v24 = vadd.f32 %v1233_v26, %v1215_v13 }
 0x1b8   :  { %v963_v59 = vrot.slane %v962_v6, 2  ;;  %v1118_v45 = vrot.slane %v1117_v22, 2 }
 0x1b9   :  { %v1255_v42 = vadd.f32 %v1253_v31, %v1235_v24 }
 0x1ba   :  { %v964_v3 = vsel %vm288_vm1, %v962_v6, %v963_v59  ;;  %v1119_v30 = vsel %vm267_vm0, %v1117_v22, %v1118_v45 }
 0x1bb   :  { %v1272_v34 = vpop.permute.xlu0 %1271  ;;  %v1137_v27 = vpop.permute.xlu1 %1136  ;;  %v966_v43 = vadd.f32 %v964_v3, %v946_v47  ;;  %v1121_v33 = vadd.f32 %v1119_v30, %v1101_v37 }
 0x1bc   :  { %v1138_v51 = vrot.slane %v1137_v27, 2  ;;  %v1273_v41 = vrot.slane %v1272_v34, 2 }
 0x1be   :  { %v1139_v36 = vsel %vm288_vm1, %v1137_v27, %v1138_v51  ;;  %v1274_v39 = vsel %vm246_vm13, %v1272_v34, %v1273_v41 }
 0x1bf   :  { %v1292_v10 = vpop.permute.xlu0 %1291  ;;  %v1276_v38 = vadd.f32 %v1274_v39, %v1255_v42 }
 0x1c0   :  { %v1293_v56 = vrot.slane %v1292_v10, 2 }
 0x1c2   :  { %v1294_v15 = vsel %vm267_vm0, %v1292_v10, %v1293_v56 }
 0x1c3   :  { %v1296_v47 = vadd.f32 %v1294_v15, %v1276_v38 }
 0x1f3   :  { %v462_v53 = vpop.permute.xlu1 %461 }
 0x1f4   :  { %v463_v12 = vrot.slane %v462_v53, 2 }
 0x1f6   :  { %v464_v18 = vsel %vm246_vm13, %v462_v53, %v463_v12 }
 0x1f7   :  { %v2229_v49 = vadd.f32 %v464_v18, %v2194_v52  ;;  %v637_v8 = vpop.permute.xlu1 %636  ;;  %v979_v50 = vpop.permute.xlu0 %978 }
 0x1f8   :  { %v638_v35 = vrot.slane %v637_v8, 2  ;;  %v980_v14 = vrot.slane %v979_v50, 2 }
 0x1f9   :  { %v2236_v25 = vrot.slane %v2229_v49, %v2360_v5  ;;  %v474_v20 = vcombine.high %v2229_v49, %v2229_v49 }
 0x1fa   :  { %v639_v52 = vsel %vm246_vm13, %v637_v8, %v638_v35  ;;  %v981_v32 = vsel %vm246_vm13, %v979_v50, %v980_v14 }
 0x1fb   :  { %v641_v61 = vadd.f32 %v639_v52, %v2196_v46  ;;  %v812_v58 = vpop.permute.xlu1 %811  ;;  %490 = vrot.lane.b32.xlu1 %v2236_v25, %s1662_s26  ;;  %v983_v28 = vadd.f32 %v981_v32, %v966_v43  ;;  %v1312_v23 = vpop.permute.xlu0 %1311  ;;  %v488_v27 = vrot.slane %v474_v20, %v2360_v5  ;;  %v489_v59 = vcombine.high %v2236_v25, %v2236_v25  ;;  %v164_v32 = vld [vmem:[#allocation2] sm:$0xf] }
 0x1fc   :  { %v813_v63 = vrot.slane %v812_v58, 2  ;;  %v1313_v2 = vrot.slane %v1312_v23, 2  ;;  %v165_v52 = vstv %s163_s16 }
 0x1fd   :  { %v656_v4 = vrot.slane %v641_v61, %v2360_v5  ;;  %v998_v21 = vrot.slane %v983_v28, %v2360_v5  ;;  %v649_v53 = vcombine.high %v641_v61, %v641_v61  ;;  %v991_v18 = vcombine.high %v983_v28, %v983_v28 }
 0x1fe   :  { %v814_v9 = vsel %vm246_vm13, %v812_v58, %v813_v63  ;;  %v1314_v62 = vsel %vm288_vm1, %v1312_v23, %v1313_v2  ;;  %v166_v58 = vmul.f32 %v165_v52, %v164_v32 }
 0x1ff   :  { %v816_v46 = vadd.f32 %v814_v9, %v799_v40  ;;  %665 = vrot.lane.b32.xlu0 %v656_v4, %s1663_s29  ;;  %v1141_v40 = vadd.f32 %v1139_v36, %v1121_v33  ;;  %v1316_v54 = vadd.f32 %v1314_v62, %v1296_v47  ;;  %v664_v12 = vcombine.high %v656_v4, %v656_v4  ;;  %v178_v25 = vpop.permute.xlu0 %177 }
 0x200   :  { %v663_v17 = vrot.slane %v649_v53, %v2360_v5  ;;  %v1006_v50 = vcombine.high %v998_v21, %v998_v21  ;;  %v1005_v11 = vrot.slane %v991_v18, %v2360_v5  ;;  %v179_v45 = vrot.slane %v178_v25, 2 }
 0x201   :  { %v1154_v1 = vpop.permute.xlu1 %1153  ;;  %v825_v0 = vrot.slane %v816_v46, %v2360_v5  ;;  %v818_v29 = vcombine.high %v816_v46, %v816_v46  ;;  %v2361_v62 = vlaneseq }
 0x202   :  { %v1155_v16 = vrot.slane %v1154_v1, 2  ;;  %v181_v43 = vsel %vm180_vm12, %v178_v25, %v179_v45  ;;  %vm1013_vm12 = vcmask 1014784  }
 0x203   :  { %834 = vrot.lane.b32.xlu1 %v825_v0, %s1664_s0  ;;  %1007 = vrot.lane.b32.xlu0 %v998_v21, %s1665_s10  ;;  %v832_v48 = vrot.slane %v818_v29, %v2360_v5  ;;  %v833_v8 = vcombine.high %v825_v0, %v825_v0  ;;  %v220_v61 = vpop.permute.xlu0 %219  ;;  %v183_v41 = vadd.f32 %v181_v43, %v166_v58 }
 0x204   :  { %v1156_v7 = vsel %vm246_vm13, %v1154_v1, %v1155_v16  ;;  %v221_v63 = vrot.slane %v220_v61, 2 }
 0x205   :  { %v1158_v44 = vadd.f32 %v1156_v7, %v1141_v40  ;;  %v1329_v37 = vpop.permute.xlu1 %1328  ;;  %v159_v7 = vand.u32 127, %v2361_v62 }
 0x206   :  { %v1330_v19 = vrot.slane %v1329_v37, 2  ;;  %v223_v4 = vsel %vm222_vm2, %v220_v61, %v221_v63 }
 0x207   :  { %v1173_v6 = vrot.slane %v1158_v44, %v2360_v5  ;;  %v1166_v49 = vcombine.high %v1158_v44, %v1158_v44  ;;  %v265_v28 = vpop.permute.xlu0 %264  ;;  %v160_v20 = vadd.s32 128, %v159_v7 }
 0x208   :  { %v1331_v22 = vsel %vm246_vm13, %v1329_v37, %v1330_v19  ;;  %v266_v31 = vrot.slane %v265_v28, 2 }
 0x209   :  { %v1333_v34 = vadd.f32 %v1331_v22, %v1316_v54  ;;  %1182 = vrot.lane.b32.xlu1 %v1173_v6, %s1666_s13  ;;  %v1180_v3 = vrot.slane %v1166_v49, %v2360_v5  ;;  %v1181_v57 = vcombine.high %v1173_v6, %v1173_v6  ;;  %v199_v26 = vpop.permute.xlu1 %198  ;;  %v161_v54 = vand.u32 15, %v159_v7 }
 0x20a   :  { %v200_v13 = vrot.slane %v199_v26, 2  ;;  %v268_v33 = vsel %vm267_vm0, %v265_v28, %v266_v31  ;;  %vm1188_vm0 = vcmask 1006592  }
 0x20b   :  { %v1348_v10 = vrot.slane %v1333_v34, %v2360_v5  ;;  %v1341_v35 = vcombine.high %v1333_v34, %v1333_v34  ;;  %vm467_vm4 = vcmp.ge.s32.totalorder %v161_v54, 2  ;;  %vm309_vm5 = vcmp.ge.s32.totalorder %v161_v54, 3 }
 0x20c   :  { %v202_v55 = vsel %vm201_vm14, %v199_v26, %v200_v13  ;;  %vm642_vm9 = vcmp.ge.s32.totalorder %v161_v54, 1 }
 0x20d   :  { %494 = vrot.lane.b32.xlu1 %v488_v27, %s1662_s26  ;;  %1357 = vrot.lane.b32.xlu0 %v1348_v10, %s1667_s14  ;;  %v1356_v14 = vcombine.high %v1348_v10, %v1348_v10  ;;  %v1355_v60 = vrot.slane %v1341_v35, %v2360_v5  ;;  %v244_v51 = vpop.permute.xlu1 %243  ;;  %v204_v24 = vadd.f32 %v202_v55, %v183_v41  ;;  %v2293_v27 = vand.u32 15, %v160_v20 }
 0x20e   :  { %v245_v23 = vrot.slane %v244_v51, 2 }
 0x20f   :  { %v225_v56 = vadd.f32 %v223_v4, %v204_v24  ;;  %vm468_vm7 = vcmp.ge.s32.totalorder %v2293_v27, 2  ;;  %vm310_vm8 = vcmp.ge.s32.totalorder %v2293_v27, 3  ;;  %vm643_vm10 = vcmp.ge.s32.totalorder %v2293_v27, 1 }
 0x210   :  { %v247_v9 = vsel %vm246_vm13, %v244_v51, %v245_v23  ;;  %vm985_vm14 = vcmp.lt.s32.totalorder %v2293_v27, 15  ;;  %vm1160_vm2 = vcmp.lt.s32.totalorder %v2293_v27, 14 }
 0x211   :  { %667 = vrot.lane.b32.xlu1 %v664_v12, %s1663_s29  ;;  %492 = vrot.lane.b32.xlu0 %v489_v59, %s1662_s26  ;;  %v286_v30 = vpop.permute.xlu1 %285  ;;  %v249_v39 = vadd.f32 %v247_v9, %v225_v56 }
 0x212   :  { %v287_v2 = vrot.slane %v286_v30, 2 }
 0x213   :  { %v304_v46 = vpop.permute.xlu0 %303  ;;  %v270_v0 = vadd.f32 %v268_v33, %v249_v39 }
 0x214   :  { %v289_v21 = vsel %vm288_vm1, %v286_v30, %v287_v2  ;;  %v305_v15 = vrot.slane %v304_v46, 2  ;;  %vm1159_vm1 = vcmp.lt.s32.totalorder %v161_v54, 14 }
 0x215   :  { %838 = vrot.lane.b32.xlu1 %v832_v48, %s1664_s0  ;;  %669 = vrot.lane.b32.xlu0 %v663_v17, %s1663_s29  ;;  %v291_v38 = vadd.f32 %v289_v21, %v270_v0 }
 0x216   :  { %v306_v47 = vsel %vm246_vm13, %v304_v46, %v305_v15  ;;  %vm984_vm13 = vcmp.lt.s32.totalorder %v161_v54, 15 }
 0x217   :  { %v308_v19 = vadd.f32 %v306_v47, %v291_v38 }
 0x219   :  { %1009 = vrot.lane.b32.xlu1 %v1006_v50, %s1665_s10  ;;  %836 = vrot.lane.b32.xlu0 %v833_v8, %s1664_s0  ;;  %v322_v34 = vrot.slane %v308_v19, %v2360_v5 }
 0x21b   :  { %v323_v17 = vcombine.high %v322_v34, %v322_v34  ;;  %v326_v48 = vsel %vm309_vm5, %v322_v34, 0.0 }
 0x21d   :  { %1186 = vrot.lane.b32.xlu1 %v1180_v3, %s1666_s13  ;;  %1011 = vrot.lane.b32.xlu0 %v1005_v11, %s1665_s10  ;;  %v327_v3 = vsel %vm310_vm8, %v323_v17, 0.0 }
 0x221   :  { %1359 = vrot.lane.b32.xlu1 %v1356_v14, %s1667_s14  ;;  %1184 = vrot.lane.b32.xlu0 %v1181_v57, %s1666_s13 }
 0x225   :  { %1361 = vrot.lane.b32.xlu0 %v1355_v60, %s1667_s14 }
 0x26d   :  { %v491_v36 = vpop.permute.xlu1 %490 }
 0x271   :  { %v666_v42 = vpop.permute.xlu0 %665 }
 0x275   :  { %v835_v1 = vpop.permute.xlu1 %834  ;;  %v1008_v16 = vpop.permute.xlu0 %1007 }
 0x27b   :  { %v2288_v40 = vpop.permute.xlu1 %1182 }
 0x27f   :  { %v495_v44 = vpop.permute.xlu1 %494  ;;  %v1358_v37 = vpop.permute.xlu0 %1357 }
 0x283   :  { %v668_v6 = vpop.permute.xlu1 %667  ;;  %v493_v22 = vpop.permute.xlu0 %492 }
 0x284   :  { %v497_v10 = vsel %vm496_vm3, %v491_v36, %v493_v22  ;;  %v498_v53 = vsel %vm496_vm3, %v493_v22, %v495_v44  ;;  %v672_v18 = vsel %vm671_vm6, %v666_v42, %v668_v6  ;;  %vm1334_vm3 = vcmp.lt.s32.totalorder %v161_v54, 13  ;;  %v2362_v54 = vld [vmem:[#allocation13_spill] sm:$0xff] }
 0x285   :  { %v501_v29 = vsel %vm467_vm4, %v497_v10, 0.0  ;;  %v502_v49 = vsel %vm468_vm7, %v498_v53, 0.0  ;;  %v676_v14 = vsel %vm642_vm9, %v672_v18, 0.0  ;;  %vm1335_vm4 = vcmp.lt.s32.totalorder %v2293_v27, 13 }
 0x286   :  { %v503_v8 = vadd.f32 %v501_v29, %v326_v48  ;;  %v504_v57 = vadd.f32 %v502_v49, %v327_v3  ;;  %v1373_v36 = vstv %s2329_s2  ;;  %v1668_v44 = vmov 1966171168   ;;  %s1669_s2 = smov [#allocation9]  }
 0x287   :  { %v839_v59 = vpop.permute.xlu1 %838  ;;  %v670_v12 = vpop.permute.xlu0 %669  ;;  %v1415_v10 = vsub.s32 0, %v2362_v54  ;;  %v1419_v53 = vsub.s32 1, %v2362_v54  ;;  %s1444_s19 = sshll.u32 %s1669_s2, 4  ;;  %s1445_s19 = int_to_ptr.vmem [resolvable:$true] %s1444_s19 }
 0x288   :  { %v673_v5 = vsel %vm671_vm6, %v668_v6, %v670_v12  ;;  %v678_v26 = vadd.f32 %v676_v14, %v503_v8  ;;  %s1620_s12 = scalar_lea.vmem %s1445_s19, 256  ;;  %p1625_p0 = scmp.lt.s32.totalorder %s1445_s19, %s1445_s19 }
 0x289   :  { %v677_v35 = vsel %vm643_vm10, %v673_v5, 0.0  ;;  %v1429_v5 = vld [vmem:[#allocation4] sm:$0xff]  ;;  %p1621_p13 = scmp.ne.s32.totalorder %s1445_s19, %s1620_s12  ;;  %p1626_p1 = scmp.lt.s32.totalorder %s1620_s12, %s1620_s12 }
 0x28a   :  { %v679_v45 = vadd.f32 %v677_v35, %v504_v57 }
 0x28b   :  { %v1010_v50 = vpop.permute.xlu1 %1009  ;;  %v837_v11 = vpop.permute.xlu0 %836  ;;  %p1627_p2 = por %p1626_p1, %p1625_p0 }
 0x28c   :  { %v841_v60 = vsel %vm840_vm11, %v835_v1, %v837_v11  ;;  %v1014_v25 = vsel %vm1013_vm12, %v1008_v16, %v1010_v50  ;;  %v842_v13 = vsel %vm840_vm11, %v837_v11, %v839_v59 }
 0x28d   :  { %v845_v43 = vadd.f32 %v841_v60, %v678_v26  ;;  %v1018_v58 = vsel %vm984_vm13, %v1014_v25, 0.0  ;;  %v846_v55 = vadd.f32 %v842_v13, %v679_v45  ;;  %p1628_p3 = pnand %p1627_p2, %p1621_p13 }
 0x28f   :  { %v1187_v52 = vpop.permute.xlu1 %1186  ;;  %v1012_v32 = vpop.permute.xlu0 %1011  ;;  %v1020_v24 = vadd.f32 %v1018_v58, %v845_v43 }
 0x290   :  { %v1015_v61 = vsel %vm1013_vm12, %v1010_v50, %v1012_v32  ;;  %v1430_v50 = vld [vmem:[#allocation4 + $0x8] sm:$0xff] }
 0x291   :  { %v1019_v51 = vsel %vm985_vm14, %v1015_v61, 0.0 }
 0x292   :  { %v1021_v9 = vadd.f32 %v1019_v51, %v846_v55 }
 0x293   :  { %v1360_v41 = vpop.permute.xlu1 %1359  ;;  %v1185_v63 = vpop.permute.xlu0 %1184 }
 0x294   :  { %v1364_v28 = vsel %vm1363_vm15, %v1358_v37, %v1360_v41  ;;  %v1189_v23 = vsel %vm1188_vm0, %v2288_v40, %v1185_v63  ;;  %v1190_v4 = vsel %vm1188_vm0, %v1185_v63, %v1187_v52  ;;  %v1392_v37 = vunpack.c.l.s4 %v1668_v44 }
 0x295   :  { %v1193_v30 = vsel %vm1159_vm1, %v1189_v23, 0.0  ;;  %v1194_v56 = vsel %vm1160_vm2, %v1190_v4, 0.0  ;;  %v1368_v31 = vsel %vm1334_vm3, %v1364_v28, 0.0 }
 0x296   :  { %v1195_v46 = vadd.f32 %v1193_v30, %v1020_v24  ;;  %v1196_v2 = vadd.f32 %v1194_v56, %v1021_v9  ;;  %v1393_v19 = vunpack.c.0.s8 %v1392_v37 }
 0x297   :  { %v1362_v39 = vpop.permute.xlu0 %1361 }
 0x298   :  { %v1370_v42 = vadd.f32 %v1368_v31, %v1195_v46  ;;  %v1365_v33 = vsel %vm1363_vm15, %v1360_v41, %v1362_v39  ;;  %v1396_v6 = vsub.s32 %v1393_v19, %v2362_v54 }
 0x299   :  { %v1369_v1 = vsel %vm1335_vm4, %v1365_v33, 0.0 }
 0x29a   :  { %v1371_v0 = vadd.f32 %v1369_v1, %v1196_v2  ;;  %v1374_v21 = vadd.f32 %v1373_v36, %v1370_v42 }
 0x29c   :  { %v1375_v15 = vadd.f32 %v1373_v36, %v1371_v0  ;;  %v1554_v16 = vmul.f32 -1.442695, %v1374_v21 }
 0x29e   :  { %1578 = vpow2.f32 %v1554_v16  ;;  %v1555_v40 = vmul.f32 -1.442695, %v1375_v15 }
 0x2a0   :  { %1580 = vpow2.f32 %v1555_v40 }
 0x2a8   :  { %v1579_v38 = vpop.eup %1578 }
 0x2a9   :  { %v1382_v62 = vadd.f32 1.0, %v1579_v38 }
 0x2aa   :  { %v1581_v7 = vpop.eup %1580 }
 0x2ab   :  { %v1383_v47 = vadd.f32 1.0, %v1581_v7  ;;  %1582 = vrcp.f32 %v1382_v62 }
 0x2ad   :  { %1584 = vrcp.f32 %v1383_v47 }
 0x2b5   :  { %v1583_v20 = vpop.eup %1582 }
 0x2b7   :  { %v1585_v22 = vpop.eup %1584 }
 0x2b8   :  { %v1390_v34 = vcombine.low %v1583_v20, %v1585_v22 }
 0x2ba   :  { %v1397_v27 = vrot.slane %v1390_v34, %v1396_v6 }
 0x2bc   :  { %v1398_v29 = vcombine.high %v1397_v27, %v1397_v27  ;;  %v1405_v59 = vrot.slane %v1397_v27, %v1396_v6 }
 0x2be   :  { %v1412_v12 = vrot.slane %v1398_v29, %v1396_v6  ;;  %v1416_v17 = vrot.slane %v1405_v59, %v1415_v10  ;;  %v1420_v48 = vrot.slane %v1405_v59, %v1419_v53 }
 0x2c0   :  { %v1424_v18 = vrot.slane %v1412_v12, %v1415_v10  ;;  %v1428_v49 = vrot.slane %v1412_v12, %v1419_v53  ;;  %v1431_v8 = vcombine.low %v1416_v17, %v1420_v48 }
 0x2c2   :  { %v1432_v11 = vcombine.low %v1424_v18, %v1428_v49  ;;  %v1435_v3 = vmul.f32 %v1431_v8, %v1429_v5 }
 0x2c4   :  { %v1436_v35 = vmul.f32 %v1432_v11, %v1430_v50  ;;  %1437 = vst [vmem:[#allocation9] sm:$0xff] %v1435_v3 }
 0x2c6   :  { %1438 = vst [vmem:[#allocation9 + $0x8] sm:$0xff] %v1436_v35 }
 0x2c7   :  { %1631 = shalt.err (!%p1628_p3)
}
 0x2c8   :  { %s1632_s23 = scalar_lea.hbm %s2330_s3, 256 }
 0x2c9   :  { %p1633_p4 = scmp.ne.s32.totalorder %s2330_s3, %s1632_s23  ;;  %p1636_p5 = scmp.lt.u32.totalorder %s1632_s23, %s2330_s3 }
 0x2cb   :  { %p1638_p6 = pnand %p1636_p5, %p1633_p4 }
 0x2cd   :  { %1641 = shalt.err (!%p1638_p6)
}
 0x2ce   :  { %1450 = dma.vmem_to_hbm [thread:$0]  %s1445_s19, 256, %s2330_s3, [#allocation6], %s1649_s1, %s1649_s1, %s1650_s25  }
 0x2cf   :  { %1646 = dma.done.wait [#allocation6], 256  }
 0x2d0   :  { %1647 = vsyncadd [#allocation6], 4294967040 }
 0x2d1   :  { %1454 = vsyncpa [#allocation5], 1 }
 0x2d2   :  { %1455 = vsyncpa [#allocation6], 1 }
 0x2d3   :  { %1456 = vsyncpa [#allocation7], 1 }

</bundles_post_ra>
